<compile_context>
chip_gen: v7x
topology: tpu7x:2x2x1
jax: 0.10.0
libtpu: 0.0.40
codegen_flags: <defaults>
</compile_context>

<pallas_src>
import functools

import numpy as np
import jax
import jax.numpy as jnp
from jax.experimental import pallas as pl
from jax.experimental.pallas import tpu as pltpu

# ---- MelSpectrogram hyper-parameters (match the PyTorch module defaults) ----
SAMPLE_RATE = 24000
N_FFT = 1024
WIN = 1024                      # win_length defaults to n_fft
HOP = 320
N_MELS = 80
N_FREQS = N_FFT // 2 + 1        # 513 (onesided STFT)
CLIP_VAL = 1e-7                 # safe_log clip value (Vocos)

# ---- TPU-friendly dims ------------------------------------------------------
# Nyquist bin (index 512) has exactly zero weight in every mel filter when
# f_max == sample_rate/2 and norm=None, so it can be dropped with bit-identical
# mel output.  513 -> 512 keeps everything lane-aligned with no zero padding.
NF_PAD = 512                    # frequency bins actually used (multiple of 128)
NM_PAD = 128                    # 80 mels padded to one lane-dense vreg width
TM_MAX = 256                    # frames (rows) per grid step (fills v6e/v7x MXU,
                                # = 2 passes on v5e's 128-wide MXU)


# ----------------------------- parameter setup ------------------------------
def _hz_to_mel(f):
    return 2595.0 * np.log10(1.0 + f / 700.0)


def _mel_to_hz(m):
    return 700.0 * (10.0 ** (m / 2595.0) - 1.0)


def _melscale_fbanks(n_freqs, f_min, f_max, n_mels, sample_rate):
    """Replicates torchaudio.functional.melscale_fbanks (htk scale, norm=None)."""
    all_freqs = np.linspace(0.0, sample_rate / 2.0, n_freqs)
    m_pts = np.linspace(_hz_to_mel(f_min), _hz_to_mel(f_max), n_mels + 2)
    f_pts = _mel_to_hz(m_pts)
    f_diff = f_pts[1:] - f_pts[:-1]                       # (n_mels+1,)
    slopes = f_pts[None, :] - all_freqs[:, None]          # (n_freqs, n_mels+2)
    down = -slopes[:, :-2] / f_diff[:-1]
    up = slopes[:, 2:] / f_diff[1:]
    return np.maximum(0.0, np.minimum(down, up))          # (n_freqs, n_mels)


@functools.lru_cache(maxsize=1)
def _constants():
    """Deterministic params: fused hann-windowed DFT basis + mel filterbank.

    Returns:
      w_fused: (N_FFT, 2*NF_PAD) bf16 -- [window*cos | -window*sin] fused so the
               DFT is a single MXU matmul per tile.
      fb:      (NF_PAD, NM_PAD)  bf16 -- mel filterbank, zero-padded 80->128.
    """
    n = np.arange(N_FFT)
    window = 0.5 - 0.5 * np.cos(2.0 * np.pi * n / N_FFT)   # periodic hann
    freqs = np.arange(NF_PAD)                               # Nyquist bin dropped
    ang = 2.0 * np.pi * np.outer(n, freqs) / N_FFT          # (n_fft, NF_PAD)
    wcos = window[:, None] * np.cos(ang)                     # window folded in
    wsin = -window[:, None] * np.sin(ang)
    w_fused = np.concatenate([wcos, wsin], axis=1)           # (n_fft, 2*NF_PAD)

    fb_full = _melscale_fbanks(N_FREQS, 0.0, SAMPLE_RATE / 2.0, N_MELS,
                               SAMPLE_RATE)                  # (513, 80)
    fb_p = np.zeros((NF_PAD, NM_PAD), np.float32)
    fb_p[:, :N_MELS] = fb_full[:NF_PAD, :]                   # drop zero Nyquist row

    return (jnp.asarray(w_fused, dtype=jnp.bfloat16),
            jnp.asarray(fb_p, dtype=jnp.bfloat16))


# ------------------------------- Pallas kernel -------------------------------
def _mel_kernel(frames_ref, w_ref, fb_ref, out_ref):
    # frames_ref: (tm, N_FFT) bf16
    # w_ref:      (N_FFT, 2*NF_PAD) bf16   fb_ref: (NF_PAD, NM_PAD) bf16
    f = frames_ref[...]
    # Single fused MXU matmul for the onesided windowed DFT (re | im).
    spec = jnp.dot(f, w_ref[...], preferred_element_type=jnp.float32)
    re = spec[:, :NF_PAD]                                    # lane-aligned split
    im = spec[:, NF_PAD:]
    mag = jnp.sqrt(re * re + im * im)                        # power=1 spectrogram (f32)
    mel = jnp.dot(mag.astype(jnp.bfloat16), fb_ref[...],
                  preferred_element_type=jnp.float32)
    out_ref[...] = jnp.log(jnp.maximum(mel, CLIP_VAL))       # safe_log (f32)


def _mel_pallas(frames2d, w_fused, fb):
    n_rows = frames2d.shape[0]
    # Big tiles fill the MXU and amortize per-grid-step overhead; clamp (to a
    # multiple of 8 sublanes) so tiny inputs don't pad to 256 rows.
    tm = min(TM_MAX, ((n_rows + 7) // 8) * 8)
    n_tiles = pl.cdiv(n_rows, tm)
    rows = n_tiles * tm
    pad_rows = rows - n_rows
    if pad_rows:
        frames2d = jnp.pad(frames2d, ((0, pad_rows), (0, 0)))

    # Advisory cost so XLA schedules the framing gather / final transpose
    # around the custom call sensibly.
    flops = 2 * rows * N_FFT * (2 * NF_PAD) + 2 * rows * NF_PAD * NM_PAD
    transcendentals = rows * (NF_PAD + NM_PAD)               # sqrt + log
    bytes_accessed = (rows * N_FFT * 2                        # bf16 frames
                      + w_fused.size * 2 + fb.size * 2        # bf16 constants
                      + rows * NM_PAD * 4)                    # f32 output

    out = pl.pallas_call(
        _mel_kernel,
        out_shape=jax.ShapeDtypeStruct((rows, NM_PAD), jnp.float32),
        grid_spec=pltpu.PrefetchScalarGridSpec(
            num_scalar_prefetch=0,
            grid=(n_tiles,),
            in_specs=[
                pl.BlockSpec((tm, N_FFT), lambda i: (i, 0)),
                pl.BlockSpec((N_FFT, 2 * NF_PAD), lambda i: (0, 0)),
                pl.BlockSpec((NF_PAD, NM_PAD), lambda i: (0, 0)),
            ],
            out_specs=pl.BlockSpec((tm, NM_PAD), lambda i: (i, 0)),
        ),
        compiler_params=pltpu.CompilerParams(
            dimension_semantics=("parallel",),                # megacore on v7x
            vmem_limit_bytes=32 * 1024 * 1024),
        cost_estimate=pl.CostEstimate(
            flops=flops,
            transcendentals=transcendentals,
            bytes_accessed=bytes_accessed),
    )(frames2d, w_fused, fb)
    return out[:n_rows, :N_MELS]


# ---------------------------------- glue -------------------------------------
def _frame(x, frame_length, hop):
    # x: (B, Lp) -> (B, T, frame_length)
    _, lp = x.shape
    n_frames = 1 + (lp - frame_length) // hop
    idx = (jnp.arange(n_frames) * hop)[:, None] + jnp.arange(frame_length)[None, :]
    return x[:, idx]


@functools.partial(jax.jit, static_argnames=("padding",))
def mel_spectrogram_features(waveform, padding="center"):
    """Forward pass of MelSpectrogramFeatures. waveform: (B, L) float32.

    Returns (B, n_mels, n_frames) float32, matching torch (B, C, L)."""
    if padding == "center":
        # torchaudio MelSpectrogram(center=True) reflect-pads n_fft//2 each side
        audio = jnp.pad(waveform, ((0, 0), (N_FFT // 2, N_FFT // 2)), mode="reflect")
    elif padding == "same":
        p = (WIN - HOP) // 2
        audio = jnp.pad(waveform, ((0, 0), (p, p)), mode="reflect")
    else:
        raise ValueError("Padding must be 'center' or 'same'.")

    # bf16 before framing: halves the HBM traffic of the 3.2x-expanded frames.
    # TODO(synk): a manual-DMA variant (padded audio via memory_space=pl.ANY)
    # would avoid materializing the overlapping frames in HBM entirely.
    audio = audio.astype(jnp.bfloat16)
    frames = _frame(audio, N_FFT, HOP)                       # (B, T, n_fft) bf16
    b, t, _ = frames.shape
    frames2d = frames.reshape(b * t, N_FFT)

    w_fused, fb = _constants()
    mel_log = _mel_pallas(frames2d, w_fused, fb)             # (B*T, n_mels) f32
    return mel_log.reshape(b, t, N_MELS).transpose(0, 2, 1)  # (B, n_mels, T)


# ------------------------------- reference -----------------------------------
def _reference(waveform, padding="center"):
    """Pure numpy float64 reference (full 513-bin math, no Pallas)."""
    wav = np.asarray(waveform, dtype=np.float64)
    if padding == "center":
        audio = np.pad(wav, ((0, 0), (N_FFT // 2, N_FFT // 2)), mode="reflect")
    else:
        p = (WIN - HOP) // 2
        audio = np.pad(wav, ((0, 0), (p, p)), mode="reflect")

    n = np.arange(N_FFT)
    window = 0.5 - 0.5 * np.cos(2.0 * np.pi * n / N_FFT)
    freqs = np.arange(N_FREQS)
    ang = 2.0 * np.pi * np.outer(n, freqs) / N_FFT
    wcos = window[:, None] * np.cos(ang)
    wsin = -window[:, None] * np.sin(ang)
    fb = _melscale_fbanks(N_FREQS, 0.0, SAMPLE_RATE / 2.0, N_MELS, SAMPLE_RATE)

    b, lp = audio.shape
    t = 1 + (lp - N_FFT) // HOP
    idx = (np.arange(t) * HOP)[:, None] + np.arange(N_FFT)[None, :]
    frames = audio[:, idx].reshape(b * t, N_FFT)
    re = frames @ wcos
    im = frames @ wsin
    mag = np.sqrt(re * re + im * im)
    mel = mag @ fb
    out = np.log(np.maximum(mel, CLIP_VAL))
    return out.reshape(b, t, N_MELS).transpose(0, 2, 1)


# ---------------------------------- main --------------------------------------
if __name__ == "__main__":
    key = jax.random.PRNGKey(0)
    B, L = 2, 3200                               # small waveform (10 hops)
    waveform = jax.random.normal(key, (B, L), dtype=jnp.float32)

    feats = mel_spectrogram_features(waveform, padding="center")
    feats = jax.block_until_ready(feats)

    expected_frames = 1 + L // HOP               # center padding -> 11 frames
    assert feats.shape == (B, N_MELS, expected_frames), feats.shape
    assert bool(jnp.all(jnp.isfinite(feats)))

    ref = _reference(np.asarray(waveform), padding="center")
    np.testing.assert_allclose(np.asarray(feats), ref, rtol=5e-2, atol=5e-2)

    print("KERNEL_OK")
</pallas_src>

<mosaic_0001>
module attributes {stable_mosaic.version = 11 : i64} {
  func.func @_mel_kernel(%arg0: i32, %arg1: memref<24x1024xbf16, #tpu.memory_space<vmem>>, %arg2: memref<1024x1024xbf16, #tpu.memory_space<vmem>>, %arg3: memref<512x128xbf16, #tpu.memory_space<vmem>>, %arg4: memref<24x128xf32, #tpu.memory_space<vmem>>) attributes {dimension_semantics = [#tpu.dimension_semantics<parallel>], iteration_bounds = array<i64: 1>, scalar_prefetch = 0 : i64, scratch_operands = 0 : i64, tpu.core_type = #tpu.core_type<tc>, window_params = [{transform_indices = @transform_0, window_bounds = array<i64: 24, 1024>}, {pipeline_mode = #tpu.pipeline_mode<synchronous>, transform_indices = @transform_1, window_bounds = array<i64: 1024, 1024>}, {pipeline_mode = #tpu.pipeline_mode<synchronous>, transform_indices = @transform_2, window_bounds = array<i64: 512, 128>}, {transform_indices = @transform_3, window_bounds = array<i64: 24, 128>}]} {
    %c0 = arith.constant 0 : index
    %c0_0 = arith.constant 0 : index
    %0 = vector.load %arg1[%c0, %c0_0] : memref<24x1024xbf16, #tpu.memory_space<vmem>>, vector<24x1024xbf16>
    %c0_1 = arith.constant 0 : index
    %c0_2 = arith.constant 0 : index
    %1 = vector.load %arg2[%c0_1, %c0_2] : memref<1024x1024xbf16, #tpu.memory_space<vmem>>, vector<1024x1024xbf16>
    %cst = arith.constant dense<0.000000e+00> : vector<24x1024xf32>
    %2 = tpu.matmul %0, %1, %cst {dimension_numbers = #tpu.dot_dimension_numbers<[1], [0], [0], [1], [0, 0, 1, 1], [], []>} : vector<24x1024xbf16>, vector<1024x1024xbf16>, vector<24x1024xf32> -> vector<24x1024xf32>
    %3 = vector.extract_strided_slice %2 {offsets = [0, 0], sizes = [24, 512], strides = [1, 1]} : vector<24x1024xf32> to vector<24x512xf32>
    %4 = vector.extract_strided_slice %2 {offsets = [0, 512], sizes = [24, 512], strides = [1, 1]} : vector<24x1024xf32> to vector<24x512xf32>
    %5 = arith.mulf %3, %3 : vector<24x512xf32>
    %6 = arith.mulf %4, %4 : vector<24x512xf32>
    %7 = arith.addf %5, %6 : vector<24x512xf32>
    %8 = math.sqrt %7 : vector<24x512xf32>
    %9 = arith.truncf %8 : vector<24x512xf32> to vector<24x512xbf16>
    %c0_3 = arith.constant 0 : index
    %c0_4 = arith.constant 0 : index
    %10 = vector.load %arg3[%c0_3, %c0_4] : memref<512x128xbf16, #tpu.memory_space<vmem>>, vector<512x128xbf16>
    %cst_5 = arith.constant dense<0.000000e+00> : vector<24x128xf32>
    %11 = tpu.matmul %9, %10, %cst_5 {dimension_numbers = #tpu.dot_dimension_numbers<[1], [0], [0], [1], [0, 0, 1, 1], [], []>} : vector<24x512xbf16>, vector<512x128xbf16>, vector<24x128xf32> -> vector<24x128xf32>
    %cst_6 = arith.constant 1.000000e-07 : f32
    %12 = vector.broadcast %cst_6 : f32 to vector<24x128xf32>
    %13 = arith.maximumf %11, %12 : vector<24x128xf32>
    %14 = math.log %13 : vector<24x128xf32>
    %c0_7 = arith.constant 0 : index
    %c0_8 = arith.constant 0 : index
    %15 = vector.load %arg4[%c0_7, %c0_8] : memref<24x128xf32, #tpu.memory_space<vmem>>, vector<24x128xf32>
    tpu.vector_store %arg4[%c0_7, %c0_8], %14 {strides = array<i32>} : memref<24x128xf32, #tpu.memory_space<vmem>>, vector<24x128xf32>,
    return
  }
  func.func @transform_0(%arg0: i32) -> (i32, i32) {
    %c0_i32 = arith.constant 0 : i32
    %c0_i32_0 = arith.constant 0 : i32
    return %arg0, %c0_i32 : i32, i32
  }
  func.func @transform_1(%arg0: i32) -> (i32, i32) {
    %c0_i32 = arith.constant 0 : i32
    %c0_i32_0 = arith.constant 0 : i32
    %c0_i32_1 = arith.constant 0 : i32
    return %c0_i32, %c0_i32_0 : i32, i32
  }
  func.func @transform_2(%arg0: i32) -> (i32, i32) {
    %c0_i32 = arith.constant 0 : i32
    %c0_i32_0 = arith.constant 0 : i32
    %c0_i32_1 = arith.constant 0 : i32
    return %c0_i32, %c0_i32_0 : i32, i32
  }
  func.func @transform_3(%arg0: i32) -> (i32, i32) {
    %c0_i32 = arith.constant 0 : i32
    %c0_i32_0 = arith.constant 0 : i32
    return %arg0, %c0_i32 : i32, i32
  }
}

</mosaic_0001>

<bundles_post_ra>
// kernel: mel_spectrogram_features.1
= control target key start
LH: loop header
LB: loop body
LE: loop exit
PB: predicated region body
PF: predicated region fallthrough
CT: control target
= control target key end

     0   :  { %s7264_s1 = inlined_call_operand.vmem [shape: bf16[1024,1024], index: 1, kind: input, shape index: {}]   ;;  %s7265_s0 = inlined_call_operand.vmem [shape: bf16[24,1024], index: 0, kind: input, shape index: {}]   ;;  %s7266_s2 = inlined_call_operand.vmem [shape: bf16[512,128], index: 2, kind: input, shape index: {}]   ;;  %s7267_s3 = inlined_call_operand.vmem [shape: f32[24,128], index: 3, kind: output, shape index: {}]  }
   0x1   :  { %v27_v0 = vld [vmem:[%s7264_s1] sm:$0xff]  ;;  %v28_v2 = vld [vmem:[%s7264_s1 + $0x8] sm:$0xff] }
   0x2   :  { %v31_v1 = vld [vmem:[%s7264_s1 + $0x20] sm:$0xff]  ;;  %v32_v4 = vld [vmem:[%s7264_s1 + $0x28] sm:$0xff] }
   0x3   :  { %v4496_v3 = vcombine.high %v27_v0, %v31_v1  ;;  %v4495_v5 = vcombine.low %v27_v0, %v31_v1  ;;  %v35_v6 = vld [vmem:[%s7264_s1 + $0x40] sm:$0xff]  ;;  %v4498_v8 = vcombine.high %v28_v2, %v32_v4  ;;  %v4497_v9 = vcombine.low %v28_v2, %v32_v4  ;;  %v36_v11 = vld [vmem:[%s7264_s1 + $0x48] sm:$0xff] }
   0x4   :  { %v39_v7 = vld [vmem:[%s7264_s1 + $0x60] sm:$0xff]  ;;  %v40_v12 = vld [vmem:[%s7264_s1 + $0x68] sm:$0xff] }
   0x5   :  { %v4504_v10 = vcombine.high %v35_v6, %v39_v7  ;;  %v43_v13 = vld [vmem:[%s7264_s1 + $0x80] sm:$0xff]  ;;  %3167 = vmatprep.subr.bf16.mxu0 %v4496_v3  ;;  %v4506_v14 = vcombine.high %v36_v11, %v40_v12  ;;  %v44_v16 = vld [vmem:[%s7264_s1 + $0x88] sm:$0xff]  ;;  %3371 = vmatprep.subr.bf16.mxu1 %v4498_v8  ;;  %v4503_v18 = vcombine.low %v35_v6, %v39_v7 }
   0x6   :  { %v47_v15 = vld [vmem:[%s7264_s1 + $0xa0] sm:$0xff]  ;;  %v48_v17 = vld [vmem:[%s7264_s1 + $0xa8] sm:$0xff]  ;;  %3168 = vmatpush1.bf16.msra.mxu0 %v4495_v5  ;;  %3372 = vmatpush1.bf16.msra.mxu1 %v4497_v9  ;;  %v4505_v19 = vcombine.low %v36_v11, %v40_v12 }
   0x7   :  { %3169 = vmatprep.subr.bf16.mxu0 %v4504_v10  ;;  %v4512_v20 = vcombine.high %v43_v13, %v47_v15  ;;  %3373 = vmatprep.subr.bf16.mxu1 %v4506_v14  ;;  %v4514_v21 = vcombine.high %v44_v16, %v48_v17  ;;  %v51_v22 = vld [vmem:[%s7264_s1 + $0xc0] sm:$0xff]  ;;  %v52_v24 = vld [vmem:[%s7264_s1 + $0xc8] sm:$0xff]  ;;  %v4511_v26 = vcombine.low %v43_v13, %v47_v15 }
   0x8   :  { %v55_v23 = vld [vmem:[%s7264_s1 + $0xe0] sm:$0xff]  ;;  %v56_v25 = vld [vmem:[%s7264_s1 + $0xe8] sm:$0xff]  ;;  %v4513_v27 = vcombine.low %v44_v16, %v48_v17 }
   0x9   :  { %v4520_v28 = vcombine.high %v51_v22, %v55_v23  ;;  %v4522_v29 = vcombine.high %v52_v24, %v56_v25  ;;  %v59_v30 = vld [vmem:[%s7264_s1 + $0x100] sm:$0xff]  ;;  %v60_v32 = vld [vmem:[%s7264_s1 + $0x108] sm:$0xff]  ;;  %v4519_v34 = vcombine.low %v51_v22, %v55_v23  ;;  %v4521_v35 = vcombine.low %v52_v24, %v56_v25 }
   0xa   :  { %3170 = vmatpush1.bf16.msra.mxu0 %v4503_v18  ;;  %3374 = vmatpush1.bf16.msra.mxu1 %v4505_v19  ;;  %v63_v31 = vld [vmem:[%s7264_s1 + $0x120] sm:$0xff]  ;;  %v64_v33 = vld [vmem:[%s7264_s1 + $0x128] sm:$0xff] }
   0xb   :  { %3171 = vmatprep.subr.bf16.mxu0 %v4512_v20  ;;  %3375 = vmatprep.subr.bf16.mxu1 %v4514_v21  ;;  %v4528_v36 = vcombine.high %v59_v30, %v63_v31  ;;  %v4530_v37 = vcombine.high %v60_v32, %v64_v33  ;;  %v67_v38 = vld [vmem:[%s7264_s1 + $0x140] sm:$0xff]  ;;  %v68_v40 = vld [vmem:[%s7264_s1 + $0x148] sm:$0xff]  ;;  %v4527_v42 = vcombine.low %v59_v30, %v63_v31 }
   0xc   :  { %v71_v39 = vld [vmem:[%s7264_s1 + $0x160] sm:$0xff]  ;;  %v72_v41 = vld [vmem:[%s7264_s1 + $0x168] sm:$0xff]  ;;  %v4529_v43 = vcombine.low %v60_v32, %v64_v33 }
   0xd   :  { %v4536_v44 = vcombine.high %v67_v38, %v71_v39  ;;  %v4538_v45 = vcombine.high %v68_v40, %v72_v41  ;;  %v75_v46 = vld [vmem:[%s7264_s1 + $0x180] sm:$0xff]  ;;  %v76_v48 = vld [vmem:[%s7264_s1 + $0x188] sm:$0xff]  ;;  %v4535_v50 = vcombine.low %v67_v38, %v71_v39  ;;  %v4537_v51 = vcombine.low %v68_v40, %v72_v41 }
   0xe   :  { %3172 = vmatpush1.bf16.msra.mxu0 %v4511_v26  ;;  %3376 = vmatpush1.bf16.msra.mxu1 %v4513_v27  ;;  %v79_v47 = vld [vmem:[%s7264_s1 + $0x1a0] sm:$0xff]  ;;  %v80_v49 = vld [vmem:[%s7264_s1 + $0x1a8] sm:$0xff] }
   0xf   :  { %3173 = vmatprep.subr.bf16.mxu0 %v4520_v28  ;;  %3377 = vmatprep.subr.bf16.mxu1 %v4522_v29  ;;  %v4544_v52 = vcombine.high %v75_v46, %v79_v47  ;;  %v5368_v53 = vld [vmem:[%s7265_s0] sm:$0xff]  ;;  %v4546_v55 = vcombine.high %v76_v48, %v80_v49  ;;  %v84_v59 = vld [vmem:[%s7264_s1 + $0x1c8] sm:$0xff]  ;;  %v4543_v61 = vcombine.low %v75_v46, %v79_v47 }
  0x10   :  { %v5373_v54 = vld [vmem:[%s7265_s0 + $0x20] sm:$0xff]  ;;  %v88_v60 = vld [vmem:[%s7264_s1 + $0x1e8] sm:$0xff]  ;;  %v4545_v62 = vcombine.low %v76_v48, %v80_v49 }
  0x11   :  { %v83_v56 = vld [vmem:[%s7264_s1 + $0x1c0] sm:$0xff]  ;;  %v5383_v58 = vcombine.high %v5368_v53, %v5373_v54  ;;  %v4554_v0 = vcombine.high %v84_v59, %v88_v60  ;;  %v92_v3 = vld [vmem:[%s7264_s1 + $0x208] sm:$0xff]  ;;  %v4553_v6 = vcombine.low %v84_v59, %v88_v60 }
  0x12   :  { %3174 = vmatpush1.bf16.msra.mxu0 %v4519_v34  ;;  %3378 = vmatpush1.bf16.msra.mxu1 %v4521_v35  ;;  %v87_v57 = vld [vmem:[%s7264_s1 + $0x1e0] sm:$0xff]  ;;  %v96_v4 = vld [vmem:[%s7264_s1 + $0x228] sm:$0xff] }
  0x13   :  { %3175 = vmatprep.subr.bf16.mxu0 %v4528_v36  ;;  %3379 = vmatprep.subr.bf16.mxu1 %v4530_v37  ;;  %v4552_v63 = vcombine.high %v83_v56, %v87_v57  ;;  %v91_v1 = vld [vmem:[%s7264_s1 + $0x200] sm:$0xff]  ;;  %v4551_v5 = vcombine.low %v83_v56, %v87_v57  ;;  %v4562_v8 = vcombine.high %v92_v3, %v96_v4  ;;  %v100_v11 = vld [vmem:[%s7264_s1 + $0x248] sm:$0xff] }
  0x14   :  { %3199 = vmatprep.mubr.bf16.mxu0 %v5383_v58  ;;  %v95_v2 = vld [vmem:[%s7264_s1 + $0x220] sm:$0xff]  ;;  %3403 = vmatprep.mubr.bf16.mxu1 %v5383_v58  ;;  %v104_v12 = vld [vmem:[%s7264_s1 + $0x268] sm:$0xff]  ;;  %v4561_v14 = vcombine.low %v92_v3, %v96_v4 }
  0x15   :  { %v4560_v7 = vcombine.high %v91_v1, %v95_v2  ;;  %v99_v9 = vld [vmem:[%s7264_s1 + $0x240] sm:$0xff]  ;;  %v4559_v13 = vcombine.low %v91_v1, %v95_v2  ;;  %v4570_v16 = vcombine.high %v100_v11, %v104_v12  ;;  %v108_v19 = vld [vmem:[%s7264_s1 + $0x288] sm:$0xff]  ;;  %v4569_v22 = vcombine.low %v100_v11, %v104_v12 }
  0x16   :  { %3176 = vmatpush1.bf16.msra.mxu0 %v4527_v42  ;;  %3380 = vmatpush1.bf16.msra.mxu1 %v4529_v43  ;;  %v103_v10 = vld [vmem:[%s7264_s1 + $0x260] sm:$0xff]  ;;  %v112_v20 = vld [vmem:[%s7264_s1 + $0x2a8] sm:$0xff] }
  0x17   :  { %3177 = vmatprep.subr.bf16.mxu0 %v4536_v44  ;;  %3381 = vmatprep.subr.bf16.mxu1 %v4538_v45  ;;  %v4568_v15 = vcombine.high %v99_v9, %v103_v10  ;;  %v107_v17 = vld [vmem:[%s7264_s1 + $0x280] sm:$0xff]  ;;  %v4567_v21 = vcombine.low %v99_v9, %v103_v10  ;;  %v4578_v24 = vcombine.high %v108_v19, %v112_v20  ;;  %v116_v27 = vld [vmem:[%s7264_s1 + $0x2c8] sm:$0xff] }
  0x18   :  { %v111_v18 = vld [vmem:[%s7264_s1 + $0x2a0] sm:$0xff]  ;;  %v120_v28 = vld [vmem:[%s7264_s1 + $0x2e8] sm:$0xff]  ;;  %v4577_v30 = vcombine.low %v108_v19, %v112_v20 }
  0x19   :  { %v4576_v23 = vcombine.high %v107_v17, %v111_v18  ;;  %v115_v25 = vld [vmem:[%s7264_s1 + $0x2c0] sm:$0xff]  ;;  %v4575_v29 = vcombine.low %v107_v17, %v111_v18  ;;  %v4586_v32 = vcombine.high %v116_v27, %v120_v28  ;;  %v124_v35 = vld [vmem:[%s7264_s1 + $0x308] sm:$0xff]  ;;  %v4585_v38 = vcombine.low %v116_v27, %v120_v28 }
  0x1a   :  { %3178 = vmatpush1.bf16.msra.mxu0 %v4535_v50  ;;  %3382 = vmatpush1.bf16.msra.mxu1 %v4537_v51  ;;  %v119_v26 = vld [vmem:[%s7264_s1 + $0x2e0] sm:$0xff]  ;;  %v128_v36 = vld [vmem:[%s7264_s1 + $0x328] sm:$0xff] }
  0x1b   :  { %3179 = vmatprep.subr.bf16.mxu0 %v4544_v52  ;;  %3383 = vmatprep.subr.bf16.mxu1 %v4546_v55  ;;  %v4584_v31 = vcombine.high %v115_v25, %v119_v26  ;;  %v123_v33 = vld [vmem:[%s7264_s1 + $0x300] sm:$0xff]  ;;  %v4583_v37 = vcombine.low %v115_v25, %v119_v26  ;;  %v4594_v40 = vcombine.high %v124_v35, %v128_v36  ;;  %v132_v43 = vld [vmem:[%s7264_s1 + $0x348] sm:$0xff] }
  0x1c   :  { %v127_v34 = vld [vmem:[%s7264_s1 + $0x320] sm:$0xff]  ;;  %v136_v44 = vld [vmem:[%s7264_s1 + $0x368] sm:$0xff]  ;;  %v4593_v46 = vcombine.low %v124_v35, %v128_v36 }
  0x1d   :  { %v4592_v39 = vcombine.high %v123_v33, %v127_v34  ;;  %v131_v41 = vld [vmem:[%s7264_s1 + $0x340] sm:$0xff]  ;;  %v4591_v45 = vcombine.low %v123_v33, %v127_v34  ;;  %v4602_v48 = vcombine.high %v132_v43, %v136_v44  ;;  %v140_v51 = vld [vmem:[%s7264_s1 + $0x388] sm:$0xff]  ;;  %v4601_v56 = vcombine.low %v132_v43, %v136_v44 }
  0x1e   :  { %3180 = vmatpush1.bf16.msra.mxu0 %v4543_v61  ;;  %3384 = vmatpush1.bf16.msra.mxu1 %v4545_v62  ;;  %v135_v42 = vld [vmem:[%s7264_s1 + $0x360] sm:$0xff]  ;;  %v144_v52 = vld [vmem:[%s7264_s1 + $0x3a8] sm:$0xff] }
  0x1f   :  { %3181 = vmatprep.subr.bf16.mxu0 %v4552_v63  ;;  %3385 = vmatprep.subr.bf16.mxu1 %v4554_v0  ;;  %v4600_v47 = vcombine.high %v131_v41, %v135_v42  ;;  %v139_v49 = vld [vmem:[%s7264_s1 + $0x380] sm:$0xff]  ;;  %v4599_v55 = vcombine.low %v131_v41, %v135_v42  ;;  %v4610_v59 = vcombine.high %v140_v51, %v144_v52  ;;  %v148_v62 = vld [vmem:[%s7264_s1 + $0x3c8] sm:$0xff] }
  0x20   :  { %v143_v50 = vld [vmem:[%s7264_s1 + $0x3a0] sm:$0xff]  ;;  %v152_v63 = vld [vmem:[%s7264_s1 + $0x3e8] sm:$0xff]  ;;  %v4609_v1 = vcombine.low %v140_v51, %v144_v52 }
  0x21   :  { %v4608_v57 = vcombine.high %v139_v49, %v143_v50  ;;  %v147_v60 = vld [vmem:[%s7264_s1 + $0x3c0] sm:$0xff]  ;;  %v4607_v0 = vcombine.low %v139_v49, %v143_v50  ;;  %v4618_v3 = vcombine.high %v148_v62, %v152_v63  ;;  %v4617_v9 = vcombine.low %v148_v62, %v152_v63  ;;  %v5555_v34 = vld [vmem:[%s7265_s0 + $0x8] sm:$0xff] }
  0x22   :  { %3182 = vmatpush1.bf16.msra.mxu0 %v4551_v5  ;;  %3386 = vmatpush1.bf16.msra.mxu1 %v4553_v6  ;;  %v151_v61 = vld [vmem:[%s7264_s1 + $0x3e0] sm:$0xff]  ;;  %v156_v6 = vld [vmem:[%s7264_s1 + $0x408] sm:$0xff] }
  0x23   :  { %3183 = vmatprep.subr.bf16.mxu0 %v4560_v7  ;;  %3387 = vmatprep.subr.bf16.mxu1 %v4562_v8  ;;  %v4616_v2 = vcombine.high %v147_v60, %v151_v61  ;;  %v155_v4 = vld [vmem:[%s7264_s1 + $0x400] sm:$0xff]  ;;  %v160_v7 = vld [vmem:[%s7264_s1 + $0x428] sm:$0xff]  ;;  %v4615_v8 = vcombine.low %v147_v60, %v151_v61 }
  0x24   :  { %v159_v5 = vld [vmem:[%s7264_s1 + $0x420] sm:$0xff]  ;;  %v4626_v11 = vcombine.high %v156_v6, %v160_v7  ;;  %v4625_v19 = vcombine.low %v156_v6, %v160_v7  ;;  %v5560_v35 = vld [vmem:[%s7265_s0 + $0x28] sm:$0xff] }
  0x25   :  { %v4624_v10 = vcombine.high %v155_v4, %v159_v5  ;;  %v163_v12 = vld [vmem:[%s7264_s1 + $0x440] sm:$0xff]  ;;  %v4623_v18 = vcombine.low %v155_v4, %v159_v5  ;;  %v5570_v42 = vcombine.high %v5555_v34, %v5560_v35  ;;  %v188_v43 = vld [vmem:[%s7264_s1 + $0x508] sm:$0xff] }
  0x26   :  { %3184 = vmatpush1.bf16.msra.mxu0 %v4559_v13  ;;  %3388 = vmatpush1.bf16.msra.mxu1 %v4561_v14  ;;  %v167_v13 = vld [vmem:[%s7264_s1 + $0x460] sm:$0xff]  ;;  %v5509_v14 = vcombine.low %v5368_v53, %v5373_v54  ;;  %v192_v44 = vld [vmem:[%s7264_s1 + $0x528] sm:$0xff] }
  0x27   :  { %3185 = vmatprep.subr.bf16.mxu0 %v4568_v15  ;;  %3389 = vmatprep.subr.bf16.mxu1 %v4570_v16  ;;  %v164_v15 = vld [vmem:[%s7264_s1 + $0x448] sm:$0xff]  ;;  %v23_v17 = vld [vmem:[%s7265_s0 + $0x40] sm:$0xff]  ;;  %v4632_v20 = vcombine.high %v163_v12, %v167_v13  ;;  %v4631_v25 = vcombine.low %v163_v12, %v167_v13 }
  0x28   :  { %v168_v16 = vld [vmem:[%s7264_s1 + $0x468] sm:$0xff]  ;;  %v171_v54 = vld [vmem:[%s7264_s1 + $0x480] sm:$0xff]  ;;  %v5550_v33 = vcombine.low %v23_v17, %v23_v17 }
  0x29   :  { %v4634_v53 = vcombine.high %v164_v15, %v168_v16  ;;  %v4633_v26 = vcombine.low %v164_v15, %v168_v16  ;;  %v191_v41 = vld [vmem:[%s7264_s1 + $0x520] sm:$0xff]  ;;  %v196_v51 = vld [vmem:[%s7264_s1 + $0x548] sm:$0xff] }
  0x2a   :  { %3186 = vmatpush1.bf16.msra.mxu0 %v4567_v21  ;;  %3390 = vmatpush1.bf16.msra.mxu1 %v4569_v22  ;;  %v175_v21 = vld [vmem:[%s7264_s1 + $0x4a0] sm:$0xff]  ;;  %v5526_v22 = vcombine.high %v23_v17, %v23_v17  ;;  %v200_v52 = vld [vmem:[%s7264_s1 + $0x568] sm:$0xff] }
  0x2b   :  { %3187 = vmatprep.subr.bf16.mxu0 %v4576_v23  ;;  %3391 = vmatprep.subr.bf16.mxu1 %v4578_v24  ;;  %v172_v23 = vld [vmem:[%s7264_s1 + $0x488] sm:$0xff]  ;;  %v4640_v27 = vcombine.high %v171_v54, %v175_v21  ;;  %v4639_v36 = vcombine.low %v171_v54, %v175_v21  ;;  %v195_v49 = vld [vmem:[%s7264_s1 + $0x540] sm:$0xff] }
  0x2c   :  { %v176_v24 = vld [vmem:[%s7264_s1 + $0x4a8] sm:$0xff]  ;;  %v199_v50 = vld [vmem:[%s7264_s1 + $0x560] sm:$0xff] }
  0x2d   :  { %v4642_v28 = vcombine.high %v172_v23, %v176_v24  ;;  %v203_v60 = vld [vmem:[%s7264_s1 + $0x580] sm:$0xff]  ;;  %v204_v62 = vld [vmem:[%s7264_s1 + $0x588] sm:$0xff] }
  0x2e   :  { %3188 = vmatpush1.bf16.msra.mxu0 %v4575_v29  ;;  %3392 = vmatpush1.bf16.msra.mxu1 %v4577_v30  ;;  %v179_v29 = vld [vmem:[%s7264_s1 + $0x4c0] sm:$0xff]  ;;  %v208_v63 = vld [vmem:[%s7264_s1 + $0x5a8] sm:$0xff] }
  0x2f   :  { %3189 = vmatprep.subr.bf16.mxu0 %v4584_v31  ;;  %3393 = vmatprep.subr.bf16.mxu1 %v4586_v32  ;;  %v183_v30 = vld [vmem:[%s7264_s1 + $0x4e0] sm:$0xff]  ;;  %v180_v31 = vld [vmem:[%s7264_s1 + $0x4c8] sm:$0xff] }
  0x30   :  { %v184_v32 = vld [vmem:[%s7264_s1 + $0x4e8] sm:$0xff]  ;;  %v207_v61 = vld [vmem:[%s7264_s1 + $0x5a0] sm:$0xff] }
  0x31   :  { %v211_v4 = vld [vmem:[%s7264_s1 + $0x5c0] sm:$0xff]  ;;  %v212_v6 = vld [vmem:[%s7264_s1 + $0x5c8] sm:$0xff] }
  0x32   :  { %3190 = vmatpush1.bf16.msra.mxu0 %v4583_v37  ;;  %3394 = vmatpush1.bf16.msra.mxu1 %v4585_v38  ;;  %v4641_v37 = vcombine.low %v172_v23, %v176_v24  ;;  %v4648_v38 = vcombine.high %v179_v29, %v183_v30  ;;  %v215_v5 = vld [vmem:[%s7264_s1 + $0x5e0] sm:$0xff]  ;;  %v216_v7 = vld [vmem:[%s7264_s1 + $0x5e8] sm:$0xff] }
  0x33   :  { %3191 = vmatprep.subr.bf16.mxu0 %v4592_v39  ;;  %3395 = vmatprep.subr.bf16.mxu1 %v4594_v40  ;;  %v4650_v39 = vcombine.high %v180_v31, %v184_v32  ;;  %v187_v40 = vld [vmem:[%s7264_s1 + $0x500] sm:$0xff]  ;;  %v220_v15 = vld [vmem:[%s7264_s1 + $0x608] sm:$0xff]  ;;  %v4679_v17 = vcombine.low %v211_v4, %v215_v5 }
  0x34   :  { %v219_v12 = vld [vmem:[%s7264_s1 + $0x600] sm:$0xff]  ;;  %v224_v16 = vld [vmem:[%s7264_s1 + $0x628] sm:$0xff] }
  0x35   :  { %v223_v13 = vld [vmem:[%s7264_s1 + $0x620] sm:$0xff]  ;;  %v228_v21 = vld [vmem:[%s7264_s1 + $0x648] sm:$0xff] }
  0x36   :  { %3192 = vmatpush1.bf16.msra.mxu0 %v4591_v45  ;;  %3396 = vmatpush1.bf16.msra.mxu1 %v4593_v46  ;;  %v4647_v45 = vcombine.low %v179_v29, %v183_v30  ;;  %v4649_v46 = vcombine.low %v180_v31, %v184_v32  ;;  %v231_v54 = vld [vmem:[%s7264_s1 + $0x660] sm:$0xff]  ;;  %v232_v23 = vld [vmem:[%s7264_s1 + $0x668] sm:$0xff]  ;;  %v4687_v24 = vcombine.low %v219_v12, %v223_v13 }
  0x37   :  { %3193 = vmatprep.subr.bf16.mxu0 %v4600_v47  ;;  %3397 = vmatprep.subr.bf16.mxu1 %v4602_v48  ;;  %v4656_v47 = vcombine.high %v187_v40, %v191_v41  ;;  %v4658_v48 = vcombine.high %v188_v43, %v192_v44  ;;  %v239_v29 = vld [vmem:[%s7264_s1 + $0x6a0] sm:$0xff]  ;;  %v236_v30 = vld [vmem:[%s7264_s1 + $0x688] sm:$0xff] }
  0x38   :  { %v240_v31 = vld [vmem:[%s7264_s1 + $0x6a8] sm:$0xff] }
  0x3a   :  { %3194 = vmatpush1.bf16.msra.mxu0 %v4599_v55  ;;  %3398 = vmatpush1.bf16.msra.mxu1 %v4601_v56  ;;  %v4655_v55 = vcombine.low %v187_v40, %v191_v41  ;;  %v4657_v56 = vcombine.low %v188_v43, %v192_v44  ;;  %v247_v40 = vld [vmem:[%s7264_s1 + $0x6e0] sm:$0xff]  ;;  %v244_v41 = vld [vmem:[%s7264_s1 + $0x6c8] sm:$0xff] }
  0x3b   :  { %3195 = vmatprep.subr.bf16.mxu0 %v4608_v57  ;;  %3399 = vmatprep.subr.bf16.mxu1 %v4610_v59  ;;  %v4664_v57 = vcombine.high %v195_v49, %v199_v50  ;;  %v4666_v59 = vcombine.high %v196_v51, %v200_v52  ;;  %v248_v43 = vld [vmem:[%s7264_s1 + $0x6e8] sm:$0xff] }
  0x3e   :  { %3196 = vmatpush1.bf16.msra.mxu0 %v4607_v0  ;;  %3400 = vmatpush1.bf16.msra.mxu1 %v4609_v1  ;;  %v4663_v0 = vcombine.low %v195_v49, %v199_v50  ;;  %v4665_v1 = vcombine.low %v196_v51, %v200_v52  ;;  %v255_v49 = vld [vmem:[%s7264_s1 + $0x720] sm:$0xff]  ;;  %v252_v50 = vld [vmem:[%s7264_s1 + $0x708] sm:$0xff] }
  0x3f   :  { %3197 = vmatprep.subr.bf16.mxu0 %v4616_v2  ;;  %3401 = vmatprep.subr.bf16.mxu1 %v4618_v3  ;;  %v4672_v2 = vcombine.high %v203_v60, %v207_v61  ;;  %v4674_v3 = vcombine.high %v204_v62, %v208_v63  ;;  %v256_v51 = vld [vmem:[%s7264_s1 + $0x728] sm:$0xff] }
  0x42   :  { %3198 = vmatpush1.bf16.msra.mxu0 %v4615_v8  ;;  %3402 = vmatpush1.bf16.msra.mxu1 %v4617_v9  ;;  %v4671_v8 = vcombine.low %v203_v60, %v207_v61  ;;  %v4673_v9 = vcombine.low %v204_v62, %v208_v63  ;;  %v263_v60 = vld [vmem:[%s7264_s1 + $0x760] sm:$0xff]  ;;  %v260_v61 = vld [vmem:[%s7264_s1 + $0x748] sm:$0xff] }
  0x43   :  { %3218 = vmatprep.subr.bf16.mxu0 %v4624_v10  ;;  %3422 = vmatprep.subr.bf16.mxu1 %v4626_v11  ;;  %v4680_v10 = vcombine.high %v211_v4, %v215_v5  ;;  %v4682_v11 = vcombine.high %v212_v6, %v216_v7  ;;  %v264_v62 = vld [vmem:[%s7264_s1 + $0x768] sm:$0xff]  ;;  %v271_v4 = vld [vmem:[%s7264_s1 + $0x7a0] sm:$0xff] }
  0x44   :  { %v268_v5 = vld [vmem:[%s7264_s1 + $0x788] sm:$0xff] }
  0x45   :  { %3200 = vmatmul.mubr.bf16.vlgmr.msra.gmra.mrb[0].mxu0 %v5509_v14  ;;  %3404 = vmatmul.mubr.bf16.vlgmr.msra.gmra.mrb[0].mxu1 %v5509_v14 }
  0x46   :  { %3219 = vmatpush1.bf16.msra.mxu0 %v4623_v18  ;;  %3423 = vmatpush1.bf16.msra.mxu1 %v4625_v19  ;;  %v4681_v18 = vcombine.low %v212_v6, %v216_v7  ;;  %v4688_v19 = vcombine.high %v219_v12, %v223_v13  ;;  %v272_v6 = vld [vmem:[%s7264_s1 + $0x7a8] sm:$0xff]  ;;  %v279_v12 = vld [vmem:[%s7264_s1 + $0x7e0] sm:$0xff] }
  0x47   :  { %3220 = vmatprep.subr.bf16.mxu0 %v4632_v20  ;;  %3424 = vmatprep.subr.bf16.mxu1 %v4634_v53  ;;  %v4690_v20 = vcombine.high %v220_v15, %v224_v16  ;;  %v227_v53 = vld [vmem:[%s7264_s1 + $0x640] sm:$0xff]  ;;  %v276_v13 = vld [vmem:[%s7264_s1 + $0x7c8] sm:$0xff] }
  0x48   :  { %3209 = vmatprep.mubr.bf16.mxu0 %v5526_v22  ;;  %3413 = vmatprep.mubr.bf16.mxu1 %v5526_v22  ;;  %v4695_v32 = vcombine.low %v227_v53, %v231_v54 }
  0x4a   :  { %3221 = vmatpush1.bf16.msra.mxu0 %v4631_v25  ;;  %3425 = vmatpush1.bf16.msra.mxu1 %v4633_v26  ;;  %v4689_v25 = vcombine.low %v220_v15, %v224_v16  ;;  %v4696_v26 = vcombine.high %v227_v53, %v231_v54  ;;  %v280_v15 = vld [vmem:[%s7264_s1 + $0x7e8] sm:$0xff]  ;;  %v287_v53 = vld [vmem:[%s7264_s1 + $0x820] sm:$0xff] }
  0x4b   :  { %3222 = vmatprep.subr.bf16.mxu0 %v4640_v27  ;;  %3426 = vmatprep.subr.bf16.mxu1 %v4642_v28  ;;  %v4698_v27 = vcombine.high %v228_v21, %v232_v23  ;;  %v235_v28 = vld [vmem:[%s7264_s1 + $0x680] sm:$0xff]  ;;  %v284_v54 = vld [vmem:[%s7264_s1 + $0x808] sm:$0xff] }
  0x4c   :  { %v4703_v44 = vcombine.low %v235_v28, %v239_v29 }
  0x4d   :  { %3210 = vmatmul.mubr.bf16.gmra.mrb[4].mxu0 %v5550_v33  ;;  %3414 = vmatmul.mubr.bf16.gmra.mrb[4].mxu1 %v5550_v33 }
  0x4e   :  { %3223 = vmatpush1.bf16.msra.mxu0 %v4639_v36  ;;  %3427 = vmatpush1.bf16.msra.mxu1 %v4641_v37  ;;  %v4697_v36 = vcombine.low %v228_v21, %v232_v23  ;;  %v4704_v37 = vcombine.high %v235_v28, %v239_v29  ;;  %v288_v21 = vld [vmem:[%s7264_s1 + $0x828] sm:$0xff]  ;;  %v295_v28 = vld [vmem:[%s7264_s1 + $0x860] sm:$0xff]  ;;  %v5734_v29 = vcombine.low %v5555_v34, %v5560_v35 }
  0x4f   :  { %3224 = vmatprep.subr.bf16.mxu0 %v4648_v38  ;;  %3428 = vmatprep.subr.bf16.mxu1 %v4650_v39  ;;  %v4706_v38 = vcombine.high %v236_v30, %v240_v31  ;;  %v243_v39 = vld [vmem:[%s7264_s1 + $0x6c0] sm:$0xff] }
  0x50   :  { %3250 = vmatprep.mubr.bf16.mxu0 %v5570_v42  ;;  %3454 = vmatprep.mubr.bf16.mxu1 %v5570_v42  ;;  %v4711_v52 = vcombine.low %v243_v39, %v247_v40  ;;  %v299_v35 = vld [vmem:[%s7264_s1 + $0x880] sm:$0xff] }
  0x52   :  { %3225 = vmatpush1.bf16.msra.mxu0 %v4647_v45  ;;  %3429 = vmatpush1.bf16.msra.mxu1 %v4649_v46  ;;  %v4705_v45 = vcombine.low %v236_v30, %v240_v31  ;;  %v4712_v46 = vcombine.high %v243_v39, %v247_v40  ;;  %v292_v30 = vld [vmem:[%s7264_s1 + $0x848] sm:$0xff]  ;;  %v303_v39 = vld [vmem:[%s7264_s1 + $0x8a0] sm:$0xff] }
  0x53   :  { %3226 = vmatprep.subr.bf16.mxu0 %v4656_v47  ;;  %3430 = vmatprep.subr.bf16.mxu1 %v4658_v48  ;;  %v4714_v47 = vcombine.high %v244_v41, %v248_v43  ;;  %v251_v48 = vld [vmem:[%s7264_s1 + $0x700] sm:$0xff]  ;;  %v296_v31 = vld [vmem:[%s7264_s1 + $0x868] sm:$0xff] }
  0x54   :  { %v4719_v63 = vcombine.low %v251_v48, %v255_v49  ;;  %v4762_v34 = vcombine.high %v292_v30, %v296_v31 }
  0x56   :  { %3227 = vmatpush1.bf16.msra.mxu0 %v4655_v55  ;;  %3431 = vmatpush1.bf16.msra.mxu1 %v4657_v56  ;;  %v4713_v55 = vcombine.low %v244_v41, %v248_v43  ;;  %v4720_v56 = vcombine.high %v251_v48, %v255_v49  ;;  %v300_v41 = vld [vmem:[%s7264_s1 + $0x888] sm:$0xff]  ;;  %v307_v48 = vld [vmem:[%s7264_s1 + $0x8c0] sm:$0xff] }
  0x57   :  { %3228 = vmatprep.subr.bf16.mxu0 %v4664_v57  ;;  %3432 = vmatprep.subr.bf16.mxu1 %v4666_v59  ;;  %v4722_v57 = vcombine.high %v252_v50, %v256_v51  ;;  %v259_v59 = vld [vmem:[%s7264_s1 + $0x740] sm:$0xff]  ;;  %v304_v43 = vld [vmem:[%s7264_s1 + $0x8a8] sm:$0xff] }
  0x58   :  { %v4727_v7 = vcombine.low %v259_v59, %v263_v60  ;;  %v311_v49 = vld [vmem:[%s7264_s1 + $0x8e0] sm:$0xff] }
  0x5a   :  { %3229 = vmatpush1.bf16.msra.mxu0 %v4663_v0  ;;  %3433 = vmatpush1.bf16.msra.mxu1 %v4665_v1  ;;  %v4721_v0 = vcombine.low %v252_v50, %v256_v51  ;;  %v4728_v1 = vcombine.high %v259_v59, %v263_v60  ;;  %v308_v50 = vld [vmem:[%s7264_s1 + $0x8c8] sm:$0xff]  ;;  %v4769_v59 = vcombine.low %v300_v41, %v304_v43 }
  0x5b   :  { %3230 = vmatprep.subr.bf16.mxu0 %v4672_v2  ;;  %3434 = vmatprep.subr.bf16.mxu1 %v4674_v3  ;;  %v4730_v2 = vcombine.high %v260_v61, %v264_v62  ;;  %v267_v3 = vld [vmem:[%s7264_s1 + $0x780] sm:$0xff]  ;;  %v312_v51 = vld [vmem:[%s7264_s1 + $0x8e8] sm:$0xff]  ;;  %v4776_v60 = vcombine.high %v307_v48, %v311_v49 }
  0x5c   :  { %v4735_v16 = vcombine.low %v267_v3, %v271_v4 }
  0x5e   :  { %3231 = vmatpush1.bf16.msra.mxu0 %v4671_v8  ;;  %3435 = vmatpush1.bf16.msra.mxu1 %v4673_v9  ;;  %v4729_v8 = vcombine.low %v260_v61, %v264_v62  ;;  %v4736_v9 = vcombine.high %v267_v3, %v271_v4  ;;  %v4778_v61 = vcombine.high %v308_v50, %v312_v51  ;;  %v315_v62 = vld [vmem:[%s7264_s1 + $0x900] sm:$0xff] }
  0x5f   :  { %3232 = vmatprep.subr.bf16.mxu0 %v4680_v10  ;;  %3436 = vmatprep.subr.bf16.mxu1 %v4682_v11  ;;  %v4738_v10 = vcombine.high %v268_v5, %v272_v6  ;;  %v275_v11 = vld [vmem:[%s7264_s1 + $0x7c0] sm:$0xff]  ;;  %v4775_v3 = vcombine.low %v307_v48, %v311_v49  ;;  %v4777_v4 = vcombine.low %v308_v50, %v312_v51 }
  0x60   :  { %v4743_v23 = vcombine.low %v275_v11, %v279_v12  ;;  %v363_v51 = vld [vmem:[%s7264_s1 + $0xa80] sm:$0xff] }
  0x62   :  { %3233 = vmatpush1.bf16.msra.mxu0 %v4679_v17  ;;  %3437 = vmatpush1.bf16.msra.mxu1 %v4681_v18  ;;  %v4737_v17 = vcombine.low %v268_v5, %v272_v6  ;;  %v4744_v18 = vcombine.high %v275_v11, %v279_v12 }
  0x63   :  { %3234 = vmatprep.subr.bf16.mxu0 %v4688_v19  ;;  %3438 = vmatprep.subr.bf16.mxu1 %v4690_v20  ;;  %v4746_v19 = vcombine.high %v276_v13, %v280_v15  ;;  %v283_v20 = vld [vmem:[%s7264_s1 + $0x800] sm:$0xff] }
  0x66   :  { %3235 = vmatpush1.bf16.msra.mxu0 %v4687_v24  ;;  %3439 = vmatpush1.bf16.msra.mxu1 %v4689_v25  ;;  %v4745_v24 = vcombine.low %v276_v13, %v280_v15  ;;  %v4752_v25 = vcombine.high %v283_v20, %v287_v53 }
  0x67   :  { %3236 = vmatprep.subr.bf16.mxu0 %v4696_v26  ;;  %3440 = vmatprep.subr.bf16.mxu1 %v4698_v27  ;;  %v4754_v26 = vcombine.high %v284_v54, %v288_v21  ;;  %v291_v27 = vld [vmem:[%s7264_s1 + $0x840] sm:$0xff] }
  0x6a   :  { %3237 = vmatpush1.bf16.msra.mxu0 %v4695_v32  ;;  %3441 = vmatpush1.bf16.msra.mxu1 %v4697_v36  ;;  %v24_v32 = vld [vmem:[%s7265_s0 + $0x48] sm:$0xff]  ;;  %v4751_v36 = vcombine.low %v283_v20, %v287_v53 }
  0x6b   :  { %3238 = vmatprep.subr.bf16.mxu0 %v4704_v37  ;;  %3442 = vmatprep.subr.bf16.mxu1 %v4706_v38  ;;  %v4753_v37 = vcombine.low %v284_v54, %v288_v21  ;;  %v4760_v38 = vcombine.high %v291_v27, %v295_v28  ;;  %v5751_v40 = vcombine.high %v24_v32, %v24_v32 }
  0x6e   :  { %3239 = vmatpush1.bf16.msra.mxu0 %v4703_v44  ;;  %3443 = vmatpush1.bf16.msra.mxu1 %v4705_v45  ;;  %v4759_v44 = vcombine.low %v291_v27, %v295_v28  ;;  %v4761_v45 = vcombine.low %v292_v30, %v296_v31 }
  0x6f   :  { %3240 = vmatprep.subr.bf16.mxu0 %v4712_v46  ;;  %3444 = vmatprep.subr.bf16.mxu1 %v4714_v47  ;;  %v4768_v46 = vcombine.high %v299_v35, %v303_v39  ;;  %v4770_v47 = vcombine.high %v300_v41, %v304_v43  ;;  %v355_v43 = vld [vmem:[%s7264_s1 + $0xa40] sm:$0xff] }
  0x72   :  { %3241 = vmatpush1.bf16.msra.mxu0 %v4711_v52  ;;  %3445 = vmatpush1.bf16.msra.mxu1 %v4713_v55  ;;  %v5775_v52 = vcombine.low %v24_v32, %v24_v32  ;;  %v5780_v55 = vld [vmem:[%s7265_s0 + $0x10] sm:$0xff]  ;;  %v347_v32 = vld [vmem:[%s7264_s1 + $0xa00] sm:$0xff] }
  0x73   :  { %3242 = vmatprep.subr.bf16.mxu0 %v4720_v56  ;;  %3446 = vmatprep.subr.bf16.mxu1 %v4722_v57  ;;  %v5785_v56 = vld [vmem:[%s7265_s0 + $0x30] sm:$0xff]  ;;  %v4767_v57 = vcombine.low %v299_v35, %v303_v39 }
  0x76   :  { %3243 = vmatpush1.bf16.msra.mxu0 %v4719_v63  ;;  %3447 = vmatpush1.bf16.msra.mxu1 %v4721_v0  ;;  %v319_v63 = vld [vmem:[%s7264_s1 + $0x920] sm:$0xff]  ;;  %v5795_v0 = vcombine.high %v5780_v55, %v5785_v56 }
  0x77   :  { %3244 = vmatprep.subr.bf16.mxu0 %v4728_v1  ;;  %3448 = vmatprep.subr.bf16.mxu1 %v4730_v2  ;;  %v316_v1 = vld [vmem:[%s7264_s1 + $0x908] sm:$0xff]  ;;  %v4784_v5 = vcombine.high %v315_v62, %v319_v63  ;;  %v4783_v11 = vcombine.low %v315_v62, %v319_v63 }
  0x78   :  { %v320_v2 = vld [vmem:[%s7264_s1 + $0x928] sm:$0xff] }
  0x79   :  { %v4786_v6 = vcombine.high %v316_v1, %v320_v2  ;;  %v4785_v12 = vcombine.low %v316_v1, %v320_v2  ;;  %v371_v2 = vld [vmem:[%s7264_s1 + $0xac0] sm:$0xff] }
  0x7a   :  { %3245 = vmatpush1.bf16.msra.mxu0 %v4727_v7  ;;  %3449 = vmatpush1.bf16.msra.mxu1 %v4729_v8  ;;  %v323_v7 = vld [vmem:[%s7264_s1 + $0x940] sm:$0xff] }
  0x7b   :  { %3246 = vmatprep.subr.bf16.mxu0 %v4736_v9  ;;  %3450 = vmatprep.subr.bf16.mxu1 %v4738_v10  ;;  %v327_v8 = vld [vmem:[%s7264_s1 + $0x960] sm:$0xff]  ;;  %v324_v9 = vld [vmem:[%s7264_s1 + $0x948] sm:$0xff] }
  0x7c   :  { %v328_v10 = vld [vmem:[%s7264_s1 + $0x968] sm:$0xff]  ;;  %v4792_v13 = vcombine.high %v323_v7, %v327_v8  ;;  %v4791_v20 = vcombine.low %v323_v7, %v327_v8 }
  0x7d   :  { %v4794_v15 = vcombine.high %v324_v9, %v328_v10  ;;  %v4793_v53 = vcombine.low %v324_v9, %v328_v10  ;;  %v379_v10 = vld [vmem:[%s7264_s1 + $0xb00] sm:$0xff] }
  0x7e   :  { %3247 = vmatpush1.bf16.msra.mxu0 %v4735_v16  ;;  %3451 = vmatpush1.bf16.msra.mxu1 %v4737_v17  ;;  %v331_v16 = vld [vmem:[%s7264_s1 + $0x980] sm:$0xff] }
  0x7f   :  { %3248 = vmatprep.subr.bf16.mxu0 %v4744_v18  ;;  %3452 = vmatprep.subr.bf16.mxu1 %v4746_v19  ;;  %v335_v17 = vld [vmem:[%s7264_s1 + $0x9a0] sm:$0xff]  ;;  %v332_v18 = vld [vmem:[%s7264_s1 + $0x988] sm:$0xff] }
  0x80   :  { %v336_v19 = vld [vmem:[%s7264_s1 + $0x9a8] sm:$0xff]  ;;  %v4800_v54 = vcombine.high %v331_v16, %v335_v17  ;;  %v4799_v27 = vcombine.low %v331_v16, %v335_v17 }
  0x81   :  { %v4802_v21 = vcombine.high %v332_v18, %v336_v19  ;;  %v4801_v28 = vcombine.low %v332_v18, %v336_v19  ;;  %v387_v19 = vld [vmem:[%s7264_s1 + $0xb40] sm:$0xff] }
  0x82   :  { %3249 = vmatpush1.bf16.msra.mxu0 %v4743_v23  ;;  %3453 = vmatpush1.bf16.msra.mxu1 %v4745_v24  ;;  %v339_v23 = vld [vmem:[%s7264_s1 + $0x9c0] sm:$0xff] }
  0x83   :  { %3269 = vmatprep.subr.bf16.mxu0 %v4752_v25  ;;  %3473 = vmatprep.subr.bf16.mxu1 %v4754_v26  ;;  %v343_v24 = vld [vmem:[%s7264_s1 + $0x9e0] sm:$0xff]  ;;  %v340_v25 = vld [vmem:[%s7264_s1 + $0x9c8] sm:$0xff] }
  0x84   :  { %v344_v26 = vld [vmem:[%s7264_s1 + $0x9e8] sm:$0xff]  ;;  %v4808_v30 = vcombine.high %v339_v23, %v343_v24 }
  0x85   :  { %3251 = vmatmul.mubr.bf16.vlgmr.msra.gmra.mrb[0].mxu0 %v5734_v29  ;;  %3455 = vmatmul.mubr.bf16.vlgmr.msra.gmra.mrb[0].mxu1 %v5734_v29  ;;  %v4810_v31 = vcombine.high %v340_v25, %v344_v26  ;;  %v4809_v35 = vcombine.low %v340_v25, %v344_v26  ;;  %v395_v26 = vld [vmem:[%s7264_s1 + $0xb80] sm:$0xff] }
  0x86   :  { %3270 = vmatpush1.bf16.msra.mxu0 %v4751_v36  ;;  %3474 = vmatpush1.bf16.msra.mxu1 %v4753_v37  ;;  %v351_v36 = vld [vmem:[%s7264_s1 + $0xa20] sm:$0xff]  ;;  %v348_v37 = vld [vmem:[%s7264_s1 + $0xa08] sm:$0xff] }
  0x87   :  { %3271 = vmatprep.subr.bf16.mxu0 %v4760_v38  ;;  %3475 = vmatprep.subr.bf16.mxu1 %v4762_v34  ;;  %v352_v38 = vld [vmem:[%s7264_s1 + $0xa28] sm:$0xff]  ;;  %v4807_v34 = vcombine.low %v339_v23, %v343_v24  ;;  %v4816_v39 = vcombine.high %v347_v32, %v351_v36 }
  0x88   :  { %3260 = vmatprep.mubr.bf16.mxu0 %v5751_v40  ;;  %3464 = vmatprep.mubr.bf16.mxu1 %v5751_v40  ;;  %v4818_v41 = vcombine.high %v348_v37, %v352_v38  ;;  %v4817_v48 = vcombine.low %v348_v37, %v352_v38  ;;  %v403_v38 = vld [vmem:[%s7264_s1 + $0xbc0] sm:$0xff] }
  0x8a   :  { %3272 = vmatpush1.bf16.msra.mxu0 %v4759_v44  ;;  %3476 = vmatpush1.bf16.msra.mxu1 %v4761_v45  ;;  %v359_v44 = vld [vmem:[%s7264_s1 + $0xa60] sm:$0xff]  ;;  %v356_v45 = vld [vmem:[%s7264_s1 + $0xa48] sm:$0xff] }
  0x8b   :  { %3273 = vmatprep.subr.bf16.mxu0 %v4768_v46  ;;  %3477 = vmatprep.subr.bf16.mxu1 %v4770_v47  ;;  %v360_v46 = vld [vmem:[%s7264_s1 + $0xa68] sm:$0xff]  ;;  %v4815_v47 = vcombine.low %v347_v32, %v351_v36  ;;  %v4824_v49 = vcombine.high %v355_v43, %v359_v44 }
  0x8c   :  { %v4826_v50 = vcombine.high %v356_v45, %v360_v46  ;;  %v4825_v62 = vcombine.low %v356_v45, %v360_v46  ;;  %v411_v46 = vld [vmem:[%s7264_s1 + $0xc00] sm:$0xff] }
  0x8d   :  { %3261 = vmatmul.mubr.bf16.gmra.mrb[4].mxu0 %v5775_v52  ;;  %3465 = vmatmul.mubr.bf16.gmra.mrb[4].mxu1 %v5775_v52 }
  0x8e   :  { %3274 = vmatpush1.bf16.msra.mxu0 %v4767_v57  ;;  %3478 = vmatpush1.bf16.msra.mxu1 %v4769_v59  ;;  %v367_v57 = vld [vmem:[%s7264_s1 + $0xaa0] sm:$0xff]  ;;  %v364_v59 = vld [vmem:[%s7264_s1 + $0xa88] sm:$0xff] }
  0x8f   :  { %3275 = vmatprep.subr.bf16.mxu0 %v4776_v60  ;;  %3479 = vmatprep.subr.bf16.mxu1 %v4778_v61  ;;  %v368_v60 = vld [vmem:[%s7264_s1 + $0xaa8] sm:$0xff]  ;;  %v4823_v61 = vcombine.low %v355_v43, %v359_v44  ;;  %v4832_v63 = vcombine.high %v363_v51, %v367_v57 }
  0x90   :  { %3301 = vmatprep.mubr.bf16.mxu0 %v5795_v0  ;;  %3505 = vmatprep.mubr.bf16.mxu1 %v5795_v0  ;;  %v4834_v1 = vcombine.high %v364_v59, %v368_v60  ;;  %v4833_v7 = vcombine.low %v364_v59, %v368_v60  ;;  %v419_v60 = vld [vmem:[%s7264_s1 + $0xc40] sm:$0xff] }
  0x92   :  { %3276 = vmatpush1.bf16.msra.mxu0 %v4775_v3  ;;  %3480 = vmatpush1.bf16.msra.mxu1 %v4777_v4  ;;  %v375_v3 = vld [vmem:[%s7264_s1 + $0xae0] sm:$0xff]  ;;  %v372_v4 = vld [vmem:[%s7264_s1 + $0xac8] sm:$0xff] }
  0x93   :  { %3277 = vmatprep.subr.bf16.mxu0 %v4784_v5  ;;  %3481 = vmatprep.subr.bf16.mxu1 %v4786_v6  ;;  %v376_v5 = vld [vmem:[%s7264_s1 + $0xae8] sm:$0xff]  ;;  %v4831_v6 = vcombine.low %v363_v51, %v367_v57  ;;  %v4840_v8 = vcombine.high %v371_v2, %v375_v3 }
  0x94   :  { %v4842_v9 = vcombine.high %v372_v4, %v376_v5  ;;  %v4841_v16 = vcombine.low %v372_v4, %v376_v5 }
  0x96   :  { %3278 = vmatpush1.bf16.msra.mxu0 %v4783_v11  ;;  %3482 = vmatpush1.bf16.msra.mxu1 %v4785_v12  ;;  %v383_v11 = vld [vmem:[%s7264_s1 + $0xb20] sm:$0xff]  ;;  %v380_v12 = vld [vmem:[%s7264_s1 + $0xb08] sm:$0xff] }
  0x97   :  { %3279 = vmatprep.subr.bf16.mxu0 %v4792_v13  ;;  %3483 = vmatprep.subr.bf16.mxu1 %v4794_v15  ;;  %v384_v13 = vld [vmem:[%s7264_s1 + $0xb28] sm:$0xff]  ;;  %v4839_v15 = vcombine.low %v371_v2, %v375_v3  ;;  %v4848_v17 = vcombine.high %v379_v10, %v383_v11  ;;  %v25_v2 = vld [vmem:[%s7265_s0 + $0x50] sm:$0xff] }
  0x98   :  { %v4850_v18 = vcombine.high %v380_v12, %v384_v13  ;;  %v4849_v23 = vcombine.low %v380_v12, %v384_v13 }
  0x9a   :  { %3280 = vmatpush1.bf16.msra.mxu0 %v4791_v20  ;;  %3484 = vmatpush1.bf16.msra.mxu1 %v4793_v53  ;;  %v391_v20 = vld [vmem:[%s7264_s1 + $0xb60] sm:$0xff]  ;;  %v388_v53 = vld [vmem:[%s7264_s1 + $0xb48] sm:$0xff] }
  0x9b   :  { %3281 = vmatprep.subr.bf16.mxu0 %v4800_v54  ;;  %3485 = vmatprep.subr.bf16.mxu1 %v4802_v21  ;;  %v392_v54 = vld [vmem:[%s7264_s1 + $0xb68] sm:$0xff]  ;;  %v4847_v21 = vcombine.low %v379_v10, %v383_v11  ;;  %v4856_v24 = vcombine.high %v387_v19, %v391_v20 }
  0x9c   :  { %v4858_v25 = vcombine.high %v388_v53, %v392_v54  ;;  %v4857_v32 = vcombine.low %v388_v53, %v392_v54  ;;  %v6010_v53 = vld [vmem:[%s7265_s0 + $0x38] sm:$0xff] }
  0x9e   :  { %3282 = vmatpush1.bf16.msra.mxu0 %v4799_v27  ;;  %3486 = vmatpush1.bf16.msra.mxu1 %v4801_v28  ;;  %v399_v27 = vld [vmem:[%s7264_s1 + $0xba0] sm:$0xff]  ;;  %v396_v28 = vld [vmem:[%s7264_s1 + $0xb88] sm:$0xff] }
  0x9f   :  { %3283 = vmatprep.subr.bf16.mxu0 %v4808_v30  ;;  %3487 = vmatprep.subr.bf16.mxu1 %v4810_v31  ;;  %v400_v30 = vld [vmem:[%s7264_s1 + $0xba8] sm:$0xff]  ;;  %v4855_v31 = vcombine.low %v387_v19, %v391_v20  ;;  %v4864_v36 = vcombine.high %v395_v26, %v399_v27  ;;  %v6000_v19 = vcombine.low %v25_v2, %v25_v2  ;;  %v6005_v20 = vld [vmem:[%s7265_s0 + $0x18] sm:$0xff] }
  0xa0   :  { %v4866_v37 = vcombine.high %v396_v28, %v400_v30  ;;  %v4865_v43 = vcombine.low %v396_v28, %v400_v30  ;;  %v444_v28 = vld [vmem:[%s7264_s1 + $0xd08] sm:$0xff] }
  0xa1   :  { %v448_v30 = vld [vmem:[%s7264_s1 + $0xd28] sm:$0xff] }
  0xa2   :  { %3284 = vmatpush1.bf16.msra.mxu0 %v4807_v34  ;;  %3488 = vmatpush1.bf16.msra.mxu1 %v4809_v35  ;;  %v407_v34 = vld [vmem:[%s7264_s1 + $0xbe0] sm:$0xff]  ;;  %v404_v35 = vld [vmem:[%s7264_s1 + $0xbc8] sm:$0xff] }
  0xa3   :  { %3285 = vmatprep.subr.bf16.mxu0 %v4816_v39  ;;  %3489 = vmatprep.subr.bf16.mxu1 %v4818_v41  ;;  %v408_v39 = vld [vmem:[%s7264_s1 + $0xbe8] sm:$0xff]  ;;  %v4863_v41 = vcombine.low %v395_v26, %v399_v27  ;;  %v4872_v44 = vcombine.high %v403_v38, %v407_v34  ;;  %v447_v26 = vld [vmem:[%s7264_s1 + $0xd20] sm:$0xff]  ;;  %v6020_v27 = vcombine.high %v6005_v20, %v6010_v53 }
  0xa4   :  { %v4874_v45 = vcombine.high %v404_v35, %v408_v39  ;;  %v4873_v51 = vcombine.low %v404_v35, %v408_v39  ;;  %v452_v35 = vld [vmem:[%s7264_s1 + $0xd48] sm:$0xff] }
  0xa5   :  { %v456_v39 = vld [vmem:[%s7264_s1 + $0xd68] sm:$0xff] }
  0xa6   :  { %3286 = vmatpush1.bf16.msra.mxu0 %v4815_v47  ;;  %3490 = vmatpush1.bf16.msra.mxu1 %v4817_v48  ;;  %v415_v47 = vld [vmem:[%s7264_s1 + $0xc20] sm:$0xff]  ;;  %v412_v48 = vld [vmem:[%s7264_s1 + $0xc08] sm:$0xff] }
  0xa7   :  { %3287 = vmatprep.subr.bf16.mxu0 %v4824_v49  ;;  %3491 = vmatprep.subr.bf16.mxu1 %v4826_v50  ;;  %v416_v49 = vld [vmem:[%s7264_s1 + $0xc28] sm:$0xff]  ;;  %v4871_v50 = vcombine.low %v403_v38, %v407_v34  ;;  %v4880_v57 = vcombine.high %v411_v46, %v415_v47  ;;  %v4879_v3 = vcombine.low %v411_v46, %v415_v47  ;;  %v451_v38 = vld [vmem:[%s7264_s1 + $0xd40] sm:$0xff] }
  0xa8   :  { %v4882_v59 = vcombine.high %v412_v48, %v416_v49  ;;  %v4881_v4 = vcombine.low %v412_v48, %v416_v49  ;;  %v455_v34 = vld [vmem:[%s7264_s1 + $0xd60] sm:$0xff]  ;;  %v460_v48 = vld [vmem:[%s7264_s1 + $0xd88] sm:$0xff] }
  0xa9   :  { %v459_v46 = vld [vmem:[%s7264_s1 + $0xd80] sm:$0xff]  ;;  %v464_v49 = vld [vmem:[%s7264_s1 + $0xda8] sm:$0xff] }
  0xaa   :  { %3288 = vmatpush1.bf16.msra.mxu0 %v4823_v61  ;;  %3492 = vmatpush1.bf16.msra.mxu1 %v4825_v62  ;;  %v423_v61 = vld [vmem:[%s7264_s1 + $0xc60] sm:$0xff]  ;;  %v5959_v62 = vcombine.low %v5780_v55, %v5785_v56 }
  0xab   :  { %3289 = vmatprep.subr.bf16.mxu0 %v4832_v63  ;;  %3493 = vmatprep.subr.bf16.mxu1 %v4834_v1  ;;  %v420_v63 = vld [vmem:[%s7264_s1 + $0xc48] sm:$0xff]  ;;  %v4888_v5 = vcombine.high %v419_v60, %v423_v61  ;;  %v427_v56 = vld [vmem:[%s7264_s1 + $0xc80] sm:$0xff]  ;;  %v4887_v10 = vcombine.low %v419_v60, %v423_v61 }
  0xac   :  { %v424_v1 = vld [vmem:[%s7264_s1 + $0xc68] sm:$0xff]  ;;  %v463_v47 = vld [vmem:[%s7264_s1 + $0xda0] sm:$0xff] }
  0xad   :  { %v4890_v55 = vcombine.high %v420_v63, %v424_v1  ;;  %v4889_v11 = vcombine.low %v420_v63, %v424_v1  ;;  %v467_v60 = vld [vmem:[%s7264_s1 + $0xdc0] sm:$0xff]  ;;  %v468_v63 = vld [vmem:[%s7264_s1 + $0xdc8] sm:$0xff] }
  0xae   :  { %3290 = vmatpush1.bf16.msra.mxu0 %v4831_v6  ;;  %3494 = vmatpush1.bf16.msra.mxu1 %v4833_v7  ;;  %v431_v6 = vld [vmem:[%s7264_s1 + $0xca0] sm:$0xff]  ;;  %v5976_v7 = vcombine.high %v25_v2, %v25_v2  ;;  %v472_v1 = vld [vmem:[%s7264_s1 + $0xde8] sm:$0xff]  ;;  %v4927_v2 = vcombine.low %v459_v46, %v463_v47 }
  0xaf   :  { %3291 = vmatprep.subr.bf16.mxu0 %v4840_v8  ;;  %3495 = vmatprep.subr.bf16.mxu1 %v4842_v9  ;;  %v428_v8 = vld [vmem:[%s7264_s1 + $0xc88] sm:$0xff]  ;;  %v4896_v12 = vcombine.high %v427_v56, %v431_v6  ;;  %v4895_v54 = vcombine.low %v427_v56, %v431_v6  ;;  %v471_v61 = vld [vmem:[%s7264_s1 + $0xde0] sm:$0xff] }
  0xb0   :  { %v432_v9 = vld [vmem:[%s7264_s1 + $0xca8] sm:$0xff]  ;;  %v479_v56 = vld [vmem:[%s7264_s1 + $0xe20] sm:$0xff] }
  0xb1   :  { %v4898_v13 = vcombine.high %v428_v8, %v432_v9  ;;  %v476_v6 = vld [vmem:[%s7264_s1 + $0xe08] sm:$0xff] }
  0xb2   :  { %3292 = vmatpush1.bf16.msra.mxu0 %v4839_v15  ;;  %3496 = vmatpush1.bf16.msra.mxu1 %v4841_v16  ;;  %v435_v15 = vld [vmem:[%s7264_s1 + $0xcc0] sm:$0xff] }
  0xb3   :  { %3293 = vmatprep.subr.bf16.mxu0 %v4848_v17  ;;  %3497 = vmatprep.subr.bf16.mxu1 %v4850_v18  ;;  %v439_v16 = vld [vmem:[%s7264_s1 + $0xce0] sm:$0xff]  ;;  %v436_v17 = vld [vmem:[%s7264_s1 + $0xcc8] sm:$0xff] }
  0xb4   :  { %v440_v18 = vld [vmem:[%s7264_s1 + $0xce8] sm:$0xff] }
  0xb6   :  { %3294 = vmatpush1.bf16.msra.mxu0 %v4847_v21  ;;  %3498 = vmatpush1.bf16.msra.mxu1 %v4849_v23  ;;  %v4897_v21 = vcombine.low %v428_v8, %v432_v9  ;;  %v4904_v23 = vcombine.high %v435_v15, %v439_v16  ;;  %v480_v8 = vld [vmem:[%s7264_s1 + $0xe28] sm:$0xff]  ;;  %v4935_v9 = vcombine.low %v467_v60, %v471_v61 }
  0xb7   :  { %3295 = vmatprep.subr.bf16.mxu0 %v4856_v24  ;;  %3499 = vmatprep.subr.bf16.mxu1 %v4858_v25  ;;  %v4906_v24 = vcombine.high %v436_v17, %v440_v18  ;;  %v443_v25 = vld [vmem:[%s7264_s1 + $0xd00] sm:$0xff] }
  0xba   :  { %3296 = vmatpush1.bf16.msra.mxu0 %v4855_v31  ;;  %3500 = vmatpush1.bf16.msra.mxu1 %v4857_v32  ;;  %v4903_v31 = vcombine.low %v435_v15, %v439_v16  ;;  %v4905_v32 = vcombine.low %v436_v17, %v440_v18  ;;  %v487_v15 = vld [vmem:[%s7264_s1 + $0xe60] sm:$0xff]  ;;  %v484_v16 = vld [vmem:[%s7264_s1 + $0xe48] sm:$0xff] }
  0xbb   :  { %3297 = vmatprep.subr.bf16.mxu0 %v4864_v36  ;;  %3501 = vmatprep.subr.bf16.mxu1 %v4866_v37  ;;  %v4912_v36 = vcombine.high %v443_v25, %v447_v26  ;;  %v4914_v37 = vcombine.high %v444_v28, %v448_v30  ;;  %v488_v17 = vld [vmem:[%s7264_s1 + $0xe68] sm:$0xff] }
  0xbe   :  { %3298 = vmatpush1.bf16.msra.mxu0 %v4863_v41  ;;  %3502 = vmatpush1.bf16.msra.mxu1 %v4865_v43  ;;  %v4911_v41 = vcombine.low %v443_v25, %v447_v26  ;;  %v4913_v43 = vcombine.low %v444_v28, %v448_v30  ;;  %v495_v25 = vld [vmem:[%s7264_s1 + $0xea0] sm:$0xff]  ;;  %v492_v26 = vld [vmem:[%s7264_s1 + $0xe88] sm:$0xff] }
  0xbf   :  { %3299 = vmatprep.subr.bf16.mxu0 %v4872_v44  ;;  %3503 = vmatprep.subr.bf16.mxu1 %v4874_v45  ;;  %v4920_v44 = vcombine.high %v451_v38, %v455_v34  ;;  %v4922_v45 = vcombine.high %v452_v35, %v456_v39  ;;  %v496_v28 = vld [vmem:[%s7264_s1 + $0xea8] sm:$0xff] }
  0xc2   :  { %3300 = vmatpush1.bf16.msra.mxu0 %v4871_v50  ;;  %3504 = vmatpush1.bf16.msra.mxu1 %v4873_v51  ;;  %v4919_v50 = vcombine.low %v451_v38, %v455_v34  ;;  %v4921_v51 = vcombine.low %v452_v35, %v456_v39  ;;  %v503_v38 = vld [vmem:[%s7264_s1 + $0xee0] sm:$0xff]  ;;  %v500_v34 = vld [vmem:[%s7264_s1 + $0xec8] sm:$0xff] }
  0xc3   :  { %3320 = vmatprep.subr.bf16.mxu0 %v4880_v57  ;;  %3524 = vmatprep.subr.bf16.mxu1 %v4882_v59  ;;  %v4928_v57 = vcombine.high %v459_v46, %v463_v47  ;;  %v4930_v59 = vcombine.high %v460_v48, %v464_v49  ;;  %v504_v35 = vld [vmem:[%s7264_s1 + $0xee8] sm:$0xff]  ;;  %v511_v46 = vld [vmem:[%s7264_s1 + $0xf20] sm:$0xff] }
  0xc4   :  { %v508_v47 = vld [vmem:[%s7264_s1 + $0xf08] sm:$0xff] }
  0xc5   :  { %3302 = vmatmul.mubr.bf16.vlgmr.msra.gmra.mrb[0].mxu0 %v5959_v62  ;;  %3506 = vmatmul.mubr.bf16.vlgmr.msra.gmra.mrb[0].mxu1 %v5959_v62 }
  0xc6   :  { %3321 = vmatpush1.bf16.msra.mxu0 %v4879_v3  ;;  %3525 = vmatpush1.bf16.msra.mxu1 %v4881_v4  ;;  %v4929_v3 = vcombine.low %v460_v48, %v464_v49  ;;  %v4936_v4 = vcombine.high %v467_v60, %v471_v61  ;;  %v512_v48 = vld [vmem:[%s7264_s1 + $0xf28] sm:$0xff]  ;;  %v519_v60 = vld [vmem:[%s7264_s1 + $0xf60] sm:$0xff] }
  0xc7   :  { %3322 = vmatprep.subr.bf16.mxu0 %v4888_v5  ;;  %3526 = vmatprep.subr.bf16.mxu1 %v4890_v55  ;;  %v4938_v5 = vcombine.high %v468_v63, %v472_v1  ;;  %v475_v55 = vld [vmem:[%s7264_s1 + $0xe00] sm:$0xff]  ;;  %v516_v61 = vld [vmem:[%s7264_s1 + $0xf48] sm:$0xff] }
  0xc8   :  { %3311 = vmatprep.mubr.bf16.mxu0 %v5976_v7  ;;  %3515 = vmatprep.mubr.bf16.mxu1 %v5976_v7  ;;  %v4943_v18 = vcombine.low %v475_v55, %v479_v56 }
  0xca   :  { %3323 = vmatpush1.bf16.msra.mxu0 %v4887_v10  ;;  %3527 = vmatpush1.bf16.msra.mxu1 %v4889_v11  ;;  %v4937_v10 = vcombine.low %v468_v63, %v472_v1  ;;  %v4944_v11 = vcombine.high %v475_v55, %v479_v56  ;;  %v520_v63 = vld [vmem:[%s7264_s1 + $0xf68] sm:$0xff]  ;;  %v527_v55 = vld [vmem:[%s7264_s1 + $0xfa0] sm:$0xff] }
  0xcb   :  { %3324 = vmatprep.subr.bf16.mxu0 %v4896_v12  ;;  %3528 = vmatprep.subr.bf16.mxu1 %v4898_v13  ;;  %v4946_v12 = vcombine.high %v476_v6, %v480_v8  ;;  %v483_v13 = vld [vmem:[%s7264_s1 + $0xe40] sm:$0xff]  ;;  %v524_v56 = vld [vmem:[%s7264_s1 + $0xf88] sm:$0xff] }
  0xcc   :  { %v4951_v30 = vcombine.low %v483_v13, %v487_v15 }
  0xcd   :  { %3312 = vmatmul.mubr.bf16.gmra.mrb[4].mxu0 %v6000_v19  ;;  %3516 = vmatmul.mubr.bf16.gmra.mrb[4].mxu1 %v6000_v19 }
  0xce   :  { %3325 = vmatpush1.bf16.msra.mxu0 %v4895_v54  ;;  %3529 = vmatpush1.bf16.msra.mxu1 %v4897_v21  ;;  %v4945_v54 = vcombine.low %v476_v6, %v480_v8  ;;  %v4952_v21 = vcombine.high %v483_v13, %v487_v15  ;;  %v528_v6 = vld [vmem:[%s7264_s1 + $0xfa8] sm:$0xff]  ;;  %v535_v13 = vld [vmem:[%s7264_s1 + $0xfe0] sm:$0xff] }
  0xcf   :  { %3326 = vmatprep.subr.bf16.mxu0 %v4904_v23  ;;  %3530 = vmatprep.subr.bf16.mxu1 %v4906_v24  ;;  %v4954_v23 = vcombine.high %v484_v16, %v488_v17  ;;  %v491_v24 = vld [vmem:[%s7264_s1 + $0xe80] sm:$0xff]  ;;  %v532_v15 = vld [vmem:[%s7264_s1 + $0xfc8] sm:$0xff] }
  0xd0   :  { %3352 = vmatprep.mubr.bf16.mxu0 %v6020_v27  ;;  %3556 = vmatprep.mubr.bf16.mxu1 %v6020_v27  ;;  %v4959_v39 = vcombine.low %v491_v24, %v495_v25 }
  0xd2   :  { %3327 = vmatpush1.bf16.msra.mxu0 %v4903_v31  ;;  %3531 = vmatpush1.bf16.msra.mxu1 %v4905_v32  ;;  %v4953_v31 = vcombine.low %v484_v16, %v488_v17  ;;  %v4960_v32 = vcombine.high %v491_v24, %v495_v25  ;;  %v536_v16 = vld [vmem:[%s7264_s1 + $0xfe8] sm:$0xff]  ;;  %v33_v24 = vld [vmem:[%s7264_s1 + $0x30] sm:$0xff]  ;;  %v30_v25 = vld [vmem:[%s7264_s1 + $0x18] sm:$0xff] }
  0xd3   :  { %3328 = vmatprep.subr.bf16.mxu0 %v4912_v36  ;;  %3532 = vmatprep.subr.bf16.mxu1 %v4914_v37  ;;  %v4962_v36 = vcombine.high %v492_v26, %v496_v28  ;;  %v499_v37 = vld [vmem:[%s7264_s1 + $0xec0] sm:$0xff] }
  0xd4   :  { %v4967_v49 = vcombine.low %v499_v37, %v503_v38 }
  0xd6   :  { %3329 = vmatpush1.bf16.msra.mxu0 %v4911_v41  ;;  %3533 = vmatpush1.bf16.msra.mxu1 %v4913_v43  ;;  %v4961_v41 = vcombine.low %v492_v26, %v496_v28  ;;  %v4968_v43 = vcombine.high %v499_v37, %v503_v38  ;;  %v34_v26 = vld [vmem:[%s7264_s1 + $0x38] sm:$0xff]  ;;  %v41_v37 = vld [vmem:[%s7264_s1 + $0x70] sm:$0xff]  ;;  %v6184_v38 = vcombine.low %v6005_v20, %v6010_v53 }
  0xd7   :  { %3330 = vmatprep.subr.bf16.mxu0 %v4920_v44  ;;  %3534 = vmatprep.subr.bf16.mxu1 %v4922_v45  ;;  %v4970_v44 = vcombine.high %v500_v34, %v504_v35  ;;  %v507_v45 = vld [vmem:[%s7264_s1 + $0xf00] sm:$0xff] }
  0xd8   :  { %v4975_v1 = vcombine.low %v507_v45, %v511_v46 }
  0xda   :  { %3331 = vmatpush1.bf16.msra.mxu0 %v4919_v50  ;;  %3535 = vmatpush1.bf16.msra.mxu1 %v4921_v51  ;;  %v4969_v50 = vcombine.low %v500_v34, %v504_v35  ;;  %v4976_v51 = vcombine.high %v507_v45, %v511_v46  ;;  %v38_v34 = vld [vmem:[%s7264_s1 + $0x58] sm:$0xff]  ;;  %v45_v45 = vld [vmem:[%s7264_s1 + $0x90] sm:$0xff] }
  0xdb   :  { %3332 = vmatprep.subr.bf16.mxu0 %v4928_v57  ;;  %3536 = vmatprep.subr.bf16.mxu1 %v4930_v59  ;;  %v4978_v57 = vcombine.high %v508_v47, %v512_v48  ;;  %v515_v59 = vld [vmem:[%s7264_s1 + $0xf40] sm:$0xff]  ;;  %v42_v35 = vld [vmem:[%s7264_s1 + $0x78] sm:$0xff]  ;;  %v49_v46 = vld [vmem:[%s7264_s1 + $0xb0] sm:$0xff] }
  0xdc   :  { %v4983_v8 = vcombine.low %v515_v59, %v519_v60  ;;  %v4510_v20 = vcombine.high %v38_v34, %v42_v35 }
  0xde   :  { %3333 = vmatpush1.bf16.msra.mxu0 %v4927_v2  ;;  %3537 = vmatpush1.bf16.msra.mxu1 %v4929_v3  ;;  %v4977_v2 = vcombine.low %v508_v47, %v512_v48  ;;  %v4984_v3 = vcombine.high %v515_v59, %v519_v60  ;;  %v46_v47 = vld [vmem:[%s7264_s1 + $0x98] sm:$0xff]  ;;  %v53_v59 = vld [vmem:[%s7264_s1 + $0xd0] sm:$0xff] }
  0xdf   :  { %3334 = vmatprep.subr.bf16.mxu0 %v4936_v4  ;;  %3538 = vmatprep.subr.bf16.mxu1 %v4938_v5  ;;  %v4986_v4 = vcombine.high %v516_v61, %v520_v63  ;;  %v523_v5 = vld [vmem:[%s7264_s1 + $0xf80] sm:$0xff]  ;;  %v50_v48 = vld [vmem:[%s7264_s1 + $0xb8] sm:$0xff]  ;;  %v57_v60 = vld [vmem:[%s7264_s1 + $0xf0] sm:$0xff] }
  0xe0   :  { %v4991_v17 = vcombine.low %v523_v5, %v527_v55 }
  0xe2   :  { %3335 = vmatpush1.bf16.msra.mxu0 %v4935_v9  ;;  %3539 = vmatpush1.bf16.msra.mxu1 %v4937_v10  ;;  %v4985_v9 = vcombine.low %v516_v61, %v520_v63  ;;  %v4992_v10 = vcombine.high %v523_v5, %v527_v55  ;;  %v54_v63 = vld [vmem:[%s7264_s1 + $0xd8] sm:$0xff]  ;;  %v61_v55 = vld [vmem:[%s7264_s1 + $0x110] sm:$0xff] }
  0xe3   :  { %3336 = vmatprep.subr.bf16.mxu0 %v4944_v11  ;;  %3540 = vmatprep.subr.bf16.mxu1 %v4946_v12  ;;  %v4994_v11 = vcombine.high %v524_v56, %v528_v6  ;;  %v531_v12 = vld [vmem:[%s7264_s1 + $0xfc0] sm:$0xff] }
  0xe4   :  { %v4999_v28 = vcombine.low %v531_v12, %v535_v13 }
  0xe6   :  { %3337 = vmatpush1.bf16.msra.mxu0 %v4943_v18  ;;  %3541 = vmatpush1.bf16.msra.mxu1 %v4945_v54  ;;  %v4993_v18 = vcombine.low %v524_v56, %v528_v6  ;;  %v5000_v54 = vcombine.high %v531_v12, %v535_v13  ;;  %v65_v56 = vld [vmem:[%s7264_s1 + $0x130] sm:$0xff]  ;;  %v62_v6 = vld [vmem:[%s7264_s1 + $0x118] sm:$0xff] }
  0xe7   :  { %3338 = vmatprep.subr.bf16.mxu0 %v4952_v21  ;;  %3542 = vmatprep.subr.bf16.mxu1 %v4954_v23  ;;  %v5002_v21 = vcombine.high %v532_v15, %v536_v16  ;;  %v29_v23 = vld [vmem:[%s7264_s1 + $0x10] sm:$0xff] }
  0xe8   :  { %v69_v13 = vld [vmem:[%s7264_s1 + $0x150] sm:$0xff] }
  0xea   :  { %3339 = vmatpush1.bf16.msra.mxu0 %v4951_v30  ;;  %3543 = vmatpush1.bf16.msra.mxu1 %v4953_v31  ;;  %v5001_v30 = vcombine.low %v532_v15, %v536_v16  ;;  %v4500_v31 = vcombine.high %v29_v23, %v33_v24  ;;  %v73_v15 = vld [vmem:[%s7264_s1 + $0x170] sm:$0xff]  ;;  %v70_v16 = vld [vmem:[%s7264_s1 + $0x158] sm:$0xff] }
  0xeb   :  { %3340 = vmatprep.subr.bf16.mxu0 %v4960_v32  ;;  %3544 = vmatprep.subr.bf16.mxu1 %v4962_v36  ;;  %v4502_v32 = vcombine.high %v30_v25, %v34_v26  ;;  %v37_v36 = vld [vmem:[%s7264_s1 + $0x50] sm:$0xff] }
  0xee   :  { %3341 = vmatpush1.bf16.msra.mxu0 %v4959_v39  ;;  %3545 = vmatpush1.bf16.msra.mxu1 %v4961_v41  ;;  %v26_v39 = vld [vmem:[%s7265_s0 + $0x58] sm:$0xff]  ;;  %v4499_v41 = vcombine.low %v29_v23, %v33_v24  ;;  %v77_v24 = vld [vmem:[%s7264_s1 + $0x190] sm:$0xff] }
  0xef   :  { %3342 = vmatprep.subr.bf16.mxu0 %v4968_v43  ;;  %3546 = vmatprep.subr.bf16.mxu1 %v4970_v44  ;;  %v4501_v43 = vcombine.low %v30_v25, %v34_v26  ;;  %v4508_v44 = vcombine.high %v37_v36, %v41_v37  ;;  %v6195_v53 = vcombine.high %v26_v39, %v26_v39  ;;  %v81_v25 = vld [vmem:[%s7264_s1 + $0x1b0] sm:$0xff]  ;;  %v82_v26 = vld [vmem:[%s7264_s1 + $0x1b8] sm:$0xff] }
  0xf0   :  { %v6219_v61 = vcombine.low %v26_v39, %v26_v39  ;;  %v4547_v39 = vcombine.low %v77_v24, %v81_v25 }
  0xf2   :  { %3343 = vmatpush1.bf16.msra.mxu0 %v4967_v49  ;;  %3547 = vmatpush1.bf16.msra.mxu1 %v4969_v50  ;;  %v4507_v49 = vcombine.low %v37_v36, %v41_v37  ;;  %v4509_v50 = vcombine.low %v38_v34, %v42_v35  ;;  %v85_v36 = vld [vmem:[%s7264_s1 + $0x1d0] sm:$0xff]  ;;  %v86_v34 = vld [vmem:[%s7264_s1 + $0x1d8] sm:$0xff] }
  0xf3   :  { %3344 = vmatprep.subr.bf16.mxu0 %v4976_v51  ;;  %3548 = vmatprep.subr.bf16.mxu1 %v4978_v57  ;;  %v4516_v51 = vcombine.high %v45_v45, %v49_v46  ;;  %v4518_v57 = vcombine.high %v46_v47, %v50_v48  ;;  %v89_v37 = vld [vmem:[%s7264_s1 + $0x1f0] sm:$0xff]  ;;  %v90_v35 = vld [vmem:[%s7264_s1 + $0x1f8] sm:$0xff] }
  0xf6   :  { %3345 = vmatpush1.bf16.msra.mxu0 %v4975_v1  ;;  %3549 = vmatpush1.bf16.msra.mxu1 %v4977_v2  ;;  %v58_v1 = vld [vmem:[%s7264_s1 + $0xf8] sm:$0xff]  ;;  %v4515_v2 = vcombine.low %v45_v45, %v49_v46  ;;  %v97_v45 = vld [vmem:[%s7264_s1 + $0x230] sm:$0xff] }
  0xf7   :  { %3346 = vmatprep.subr.bf16.mxu0 %v4984_v3  ;;  %3550 = vmatprep.subr.bf16.mxu1 %v4986_v4  ;;  %v4517_v3 = vcombine.low %v46_v47, %v50_v48  ;;  %v4524_v4 = vcombine.high %v53_v59, %v57_v60  ;;  %v4526_v5 = vcombine.high %v54_v63, %v58_v1  ;;  %v94_v46 = vld [vmem:[%s7264_s1 + $0x218] sm:$0xff] }
  0xf8   :  { %v98_v47 = vld [vmem:[%s7264_s1 + $0x238] sm:$0xff]  ;;  %v4555_v48 = vcombine.low %v85_v36, %v89_v37 }
  0xfa   :  { %3347 = vmatpush1.bf16.msra.mxu0 %v4983_v8  ;;  %3551 = vmatpush1.bf16.msra.mxu1 %v4985_v9  ;;  %v66_v8 = vld [vmem:[%s7264_s1 + $0x138] sm:$0xff]  ;;  %v4523_v9 = vcombine.low %v53_v59, %v57_v60  ;;  %v105_v59 = vld [vmem:[%s7264_s1 + $0x270] sm:$0xff] }
  0xfb   :  { %3348 = vmatprep.subr.bf16.mxu0 %v4992_v10  ;;  %3552 = vmatprep.subr.bf16.mxu1 %v4994_v11  ;;  %v4525_v10 = vcombine.low %v54_v63, %v58_v1  ;;  %v4532_v11 = vcombine.high %v61_v55, %v65_v56  ;;  %v4534_v12 = vcombine.high %v62_v6, %v66_v8  ;;  %v102_v60 = vld [vmem:[%s7264_s1 + $0x258] sm:$0xff] }
  0xfc   :  { %v106_v63 = vld [vmem:[%s7264_s1 + $0x278] sm:$0xff] }
  0xfe   :  { %3349 = vmatpush1.bf16.msra.mxu0 %v4991_v17  ;;  %3553 = vmatpush1.bf16.msra.mxu1 %v4993_v18  ;;  %v74_v17 = vld [vmem:[%s7264_s1 + $0x178] sm:$0xff]  ;;  %v4531_v18 = vcombine.low %v61_v55, %v65_v56  ;;  %v113_v55 = vld [vmem:[%s7264_s1 + $0x2b0] sm:$0xff] }
  0xff   :  { %3350 = vmatprep.subr.bf16.mxu0 %v5000_v54  ;;  %3554 = vmatprep.subr.bf16.mxu1 %v5002_v21  ;;  %v4533_v54 = vcombine.low %v62_v6, %v66_v8  ;;  %v4540_v21 = vcombine.high %v69_v13, %v73_v15  ;;  %v4542_v23 = vcombine.high %v70_v16, %v74_v17  ;;  %v110_v56 = vld [vmem:[%s7264_s1 + $0x298] sm:$0xff] }
 0x100   :  { %v114_v6 = vld [vmem:[%s7264_s1 + $0x2b8] sm:$0xff] }
 0x102   :  { %3351 = vmatpush1.bf16.msra.mxu0 %v4999_v28  ;;  %3555 = vmatpush1.bf16.msra.mxu1 %v5001_v30  ;;  %v4539_v28 = vcombine.low %v69_v13, %v73_v15  ;;  %v4541_v30 = vcombine.low %v70_v16, %v74_v17  ;;  %v121_v13 = vld [vmem:[%s7264_s1 + $0x2f0] sm:$0xff]  ;;  %v118_v15 = vld [vmem:[%s7264_s1 + $0x2d8] sm:$0xff] }
 0x103   :  { %3575 = vmatprep.subr.bf16.mxu0 %v4500_v31  ;;  %3779 = vmatprep.subr.bf16.mxu1 %v4502_v32  ;;  %v4548_v31 = vcombine.high %v77_v24, %v81_v25  ;;  %v122_v16 = vld [vmem:[%s7264_s1 + $0x2f8] sm:$0xff]  ;;  %v129_v24 = vld [vmem:[%s7264_s1 + $0x330] sm:$0xff] }
 0x104   :  { %v126_v25 = vld [vmem:[%s7264_s1 + $0x318] sm:$0xff] }
 0x105   :  { %3353 = vmatmul.mubr.bf16.vlgmr.msra.gmra.mrb[0].mxu0 %v6184_v38  ;;  %3557 = vmatmul.mubr.bf16.vlgmr.msra.gmra.mrb[0].mxu1 %v6184_v38 }
 0x106   :  { %3576 = vmatpush1.bf16.msra.mxu0 %v4499_v41  ;;  %3780 = vmatpush1.bf16.msra.mxu1 %v4501_v43  ;;  %v4556_v43 = vcombine.high %v85_v36, %v89_v37  ;;  %v137_v36 = vld [vmem:[%s7264_s1 + $0x370] sm:$0xff]  ;;  %v134_v37 = vld [vmem:[%s7264_s1 + $0x358] sm:$0xff] }
 0x107   :  { %3577 = vmatprep.subr.bf16.mxu0 %v4508_v44  ;;  %3781 = vmatprep.subr.bf16.mxu1 %v4510_v20  ;;  %v4558_v44 = vcombine.high %v86_v34, %v90_v35  ;;  %v93_v20 = vld [vmem:[%s7264_s1 + $0x210] sm:$0xff] }
 0x108   :  { %3362 = vmatprep.mubr.bf16.mxu0 %v6195_v53  ;;  %3566 = vmatprep.mubr.bf16.mxu1 %v6195_v53  ;;  %v4563_v1 = vcombine.low %v93_v20, %v97_v45 }
 0x10a   :  { %3578 = vmatpush1.bf16.msra.mxu0 %v4507_v49  ;;  %3782 = vmatpush1.bf16.msra.mxu1 %v4509_v50  ;;  %v4557_v49 = vcombine.low %v86_v34, %v90_v35  ;;  %v4564_v50 = vcombine.high %v93_v20, %v97_v45  ;;  %v138_v34 = vld [vmem:[%s7264_s1 + $0x378] sm:$0xff]  ;;  %v145_v20 = vld [vmem:[%s7264_s1 + $0x3b0] sm:$0xff] }
 0x10b   :  { %3579 = vmatprep.subr.bf16.mxu0 %v4516_v51  ;;  %3783 = vmatprep.subr.bf16.mxu1 %v4518_v57  ;;  %v4566_v51 = vcombine.high %v94_v46, %v98_v47  ;;  %v101_v57 = vld [vmem:[%s7264_s1 + $0x250] sm:$0xff]  ;;  %v142_v45 = vld [vmem:[%s7264_s1 + $0x398] sm:$0xff] }
 0x10c   :  { %v4571_v8 = vcombine.low %v101_v57, %v105_v59 }
 0x10d   :  { %3363 = vmatmul.mubr.bf16.gmra.mrb[4].mxu0 %v6219_v61  ;;  %3567 = vmatmul.mubr.bf16.gmra.mrb[4].mxu1 %v6219_v61 }
 0x10e   :  { %3580 = vmatpush1.bf16.msra.mxu0 %v4515_v2  ;;  %3784 = vmatpush1.bf16.msra.mxu1 %v4517_v3  ;;  %v4565_v2 = vcombine.low %v94_v46, %v98_v47  ;;  %v4572_v3 = vcombine.high %v101_v57, %v105_v59  ;;  %v146_v46 = vld [vmem:[%s7264_s1 + $0x3b8] sm:$0xff]  ;;  %v153_v57 = vld [vmem:[%s7264_s1 + $0x3f0] sm:$0xff] }
 0x10f   :  { %3581 = vmatprep.subr.bf16.mxu0 %v4524_v4  ;;  %3785 = vmatprep.subr.bf16.mxu1 %v4526_v5  ;;  %v4574_v4 = vcombine.high %v102_v60, %v106_v63  ;;  %v109_v5 = vld [vmem:[%s7264_s1 + $0x290] sm:$0xff]  ;;  %v150_v59 = vld [vmem:[%s7264_s1 + $0x3d8] sm:$0xff] }
 0x110   :  { %3607 = vmatprep.mubr.bf16.mxu0 %v5383_v58  ;;  %3811 = vmatprep.mubr.bf16.mxu1 %v5383_v58  ;;  %v78_v58 = vld [vmem:[%s7264_s1 + $0x198] sm:$0xff]  ;;  %v4579_v17 = vcombine.low %v109_v5, %v113_v55 }
 0x111   :  { %v4550_v32 = vcombine.high %v78_v58, %v82_v26  ;;  %v4549_v41 = vcombine.low %v78_v58, %v82_v26  ;;  %v130_v58 = vld [vmem:[%s7264_s1 + $0x338] sm:$0xff] }
 0x112   :  { %3582 = vmatpush1.bf16.msra.mxu0 %v4523_v9  ;;  %3786 = vmatpush1.bf16.msra.mxu1 %v4525_v10  ;;  %v4573_v9 = vcombine.low %v102_v60, %v106_v63  ;;  %v4580_v10 = vcombine.high %v109_v5, %v113_v55  ;;  %v154_v60 = vld [vmem:[%s7264_s1 + $0x3f8] sm:$0xff]  ;;  %v161_v5 = vld [vmem:[%s7264_s1 + $0x430] sm:$0xff] }
 0x113   :  { %3583 = vmatprep.subr.bf16.mxu0 %v4532_v11  ;;  %3787 = vmatprep.subr.bf16.mxu1 %v4534_v12  ;;  %v4582_v11 = vcombine.high %v110_v56, %v114_v6  ;;  %v117_v12 = vld [vmem:[%s7264_s1 + $0x2d0] sm:$0xff]  ;;  %v158_v55 = vld [vmem:[%s7264_s1 + $0x418] sm:$0xff] }
 0x114   :  { %v4587_v26 = vcombine.low %v117_v12, %v121_v13 }
 0x116   :  { %3584 = vmatpush1.bf16.msra.mxu0 %v4531_v18  ;;  %3788 = vmatpush1.bf16.msra.mxu1 %v4533_v54  ;;  %v4581_v18 = vcombine.low %v110_v56, %v114_v6  ;;  %v4588_v54 = vcombine.high %v117_v12, %v121_v13  ;;  %v162_v56 = vld [vmem:[%s7264_s1 + $0x438] sm:$0xff]  ;;  %v169_v12 = vld [vmem:[%s7264_s1 + $0x470] sm:$0xff] }
 0x117   :  { %3585 = vmatprep.subr.bf16.mxu0 %v4540_v21  ;;  %3789 = vmatprep.subr.bf16.mxu1 %v4542_v23  ;;  %v4590_v21 = vcombine.high %v118_v15, %v122_v16  ;;  %v125_v23 = vld [vmem:[%s7264_s1 + $0x310] sm:$0xff]  ;;  %v166_v13 = vld [vmem:[%s7264_s1 + $0x458] sm:$0xff] }
 0x118   :  { %v4595_v35 = vcombine.low %v125_v23, %v129_v24 }
 0x11a   :  { %3586 = vmatpush1.bf16.msra.mxu0 %v4539_v28  ;;  %3790 = vmatpush1.bf16.msra.mxu1 %v4541_v30  ;;  %v4589_v28 = vcombine.low %v118_v15, %v122_v16  ;;  %v4596_v30 = vcombine.high %v125_v23, %v129_v24  ;;  %v170_v15 = vld [vmem:[%s7264_s1 + $0x478] sm:$0xff]  ;;  %v177_v23 = vld [vmem:[%s7264_s1 + $0x4b0] sm:$0xff] }
 0x11b   :  { %3587 = vmatprep.subr.bf16.mxu0 %v4548_v31  ;;  %3791 = vmatprep.subr.bf16.mxu1 %v4550_v32  ;;  %v4598_v31 = vcombine.high %v126_v25, %v130_v58  ;;  %v133_v32 = vld [vmem:[%s7264_s1 + $0x350] sm:$0xff]  ;;  %v174_v24 = vld [vmem:[%s7264_s1 + $0x498] sm:$0xff] }
 0x11c   :  { %v4603_v47 = vcombine.low %v133_v32, %v137_v36 }
 0x11e   :  { %3588 = vmatpush1.bf16.msra.mxu0 %v4547_v39  ;;  %3792 = vmatpush1.bf16.msra.mxu1 %v4549_v41  ;;  %v4597_v39 = vcombine.low %v126_v25, %v130_v58  ;;  %v4604_v41 = vcombine.high %v133_v32, %v137_v36  ;;  %v178_v25 = vld [vmem:[%s7264_s1 + $0x4b8] sm:$0xff]  ;;  %v185_v32 = vld [vmem:[%s7264_s1 + $0x4f0] sm:$0xff] }
 0x11f   :  { %3589 = vmatprep.subr.bf16.mxu0 %v4556_v43  ;;  %3793 = vmatprep.subr.bf16.mxu1 %v4558_v44  ;;  %v4606_v43 = vcombine.high %v134_v37, %v138_v34  ;;  %v141_v44 = vld [vmem:[%s7264_s1 + $0x390] sm:$0xff]  ;;  %v186_v36 = vld [vmem:[%s7264_s1 + $0x4f8] sm:$0xff] }
 0x120   :  { %v4611_v63 = vcombine.low %v141_v44, %v145_v20 }
 0x122   :  { %3590 = vmatpush1.bf16.msra.mxu0 %v4555_v48  ;;  %3794 = vmatpush1.bf16.msra.mxu1 %v4557_v49  ;;  %v4605_v48 = vcombine.low %v134_v37, %v138_v34  ;;  %v4612_v49 = vcombine.high %v141_v44, %v145_v20  ;;  %v4645_v34 = vcombine.low %v174_v24, %v178_v25  ;;  %v194_v44 = vld [vmem:[%s7264_s1 + $0x538] sm:$0xff] }
 0x123   :  { %3591 = vmatprep.subr.bf16.mxu0 %v4564_v50  ;;  %3795 = vmatprep.subr.bf16.mxu1 %v4566_v51  ;;  %v4614_v50 = vcombine.high %v142_v45, %v146_v46  ;;  %v149_v51 = vld [vmem:[%s7264_s1 + $0x3d0] sm:$0xff] }
 0x124   :  { %v4619_v6 = vcombine.low %v149_v51, %v153_v57 }
 0x126   :  { %3592 = vmatpush1.bf16.msra.mxu0 %v4563_v1  ;;  %3796 = vmatpush1.bf16.msra.mxu1 %v4565_v2  ;;  %v4613_v1 = vcombine.low %v142_v45, %v146_v46  ;;  %v4620_v2 = vcombine.high %v149_v51, %v153_v57 }
 0x127   :  { %3593 = vmatprep.subr.bf16.mxu0 %v4572_v3  ;;  %3797 = vmatprep.subr.bf16.mxu1 %v4574_v4  ;;  %v4622_v3 = vcombine.high %v150_v59, %v154_v60  ;;  %v157_v4 = vld [vmem:[%s7264_s1 + $0x410] sm:$0xff] }
 0x128   :  { %v4627_v16 = vcombine.low %v157_v4, %v161_v5 }
 0x12a   :  { %3594 = vmatpush1.bf16.msra.mxu0 %v4571_v8  ;;  %3798 = vmatpush1.bf16.msra.mxu1 %v4573_v9  ;;  %v4621_v8 = vcombine.low %v150_v59, %v154_v60  ;;  %v4628_v9 = vcombine.high %v157_v4, %v161_v5 }
 0x12b   :  { %3595 = vmatprep.subr.bf16.mxu0 %v4580_v10  ;;  %3799 = vmatprep.subr.bf16.mxu1 %v4582_v11  ;;  %v4630_v10 = vcombine.high %v158_v55, %v162_v56  ;;  %v165_v11 = vld [vmem:[%s7264_s1 + $0x450] sm:$0xff] }
 0x12c   :  { %v4635_v58 = vcombine.low %v165_v11, %v169_v12 }
 0x12e   :  { %3596 = vmatpush1.bf16.msra.mxu0 %v4579_v17  ;;  %3800 = vmatpush1.bf16.msra.mxu1 %v4581_v18  ;;  %v4629_v17 = vcombine.low %v158_v55, %v162_v56  ;;  %v4636_v18 = vcombine.high %v165_v11, %v169_v12  ;;  %v213_v56 = vld [vmem:[%s7264_s1 + $0x5d0] sm:$0xff] }
 0x12f   :  { %3597 = vmatprep.subr.bf16.mxu0 %v4588_v54  ;;  %3801 = vmatprep.subr.bf16.mxu1 %v4590_v21  ;;  %v4638_v54 = vcombine.high %v166_v13, %v170_v15  ;;  %v173_v21 = vld [vmem:[%s7264_s1 + $0x490] sm:$0xff] }
 0x130   :  { %v4643_v37 = vcombine.low %v173_v21, %v177_v23 }
 0x132   :  { %3598 = vmatpush1.bf16.msra.mxu0 %v4587_v26  ;;  %3802 = vmatpush1.bf16.msra.mxu1 %v4589_v28  ;;  %v4637_v26 = vcombine.low %v166_v13, %v170_v15  ;;  %v4644_v28 = vcombine.high %v173_v21, %v177_v23  ;;  %v221_v15 = vld [vmem:[%s7264_s1 + $0x610] sm:$0xff] }
 0x133   :  { %3599 = vmatprep.subr.bf16.mxu0 %v4596_v30  ;;  %3803 = vmatprep.subr.bf16.mxu1 %v4598_v31  ;;  %v4646_v30 = vcombine.high %v174_v24, %v178_v25  ;;  %v181_v31 = vld [vmem:[%s7264_s1 + $0x4d0] sm:$0xff] }
 0x134   :  { %v4651_v20 = vcombine.low %v181_v31, %v185_v32  ;;  %v229_v25 = vld [vmem:[%s7264_s1 + $0x650] sm:$0xff] }
 0x136   :  { %3600 = vmatpush1.bf16.msra.mxu0 %v4595_v35  ;;  %3804 = vmatpush1.bf16.msra.mxu1 %v4597_v39  ;;  %v4652_v35 = vcombine.high %v181_v31, %v185_v32 }
 0x137   :  { %3601 = vmatprep.subr.bf16.mxu0 %v4604_v41  ;;  %3805 = vmatprep.subr.bf16.mxu1 %v4606_v43  ;;  %v189_v41 = vld [vmem:[%s7264_s1 + $0x510] sm:$0xff] }
 0x138   :  { %v193_v43 = vld [vmem:[%s7264_s1 + $0x530] sm:$0xff] }
 0x139   :  { %v4660_v46 = vcombine.high %v189_v41, %v193_v43  ;;  %v4659_v51 = vcombine.low %v189_v41, %v193_v43 }
 0x13a   :  { %3602 = vmatpush1.bf16.msra.mxu0 %v4603_v47  ;;  %3806 = vmatpush1.bf16.msra.mxu1 %v4605_v48  ;;  %v197_v48 = vld [vmem:[%s7264_s1 + $0x550] sm:$0xff] }
 0x13b   :  { %3603 = vmatprep.subr.bf16.mxu0 %v4612_v49  ;;  %3807 = vmatprep.subr.bf16.mxu1 %v4614_v50  ;;  %v201_v49 = vld [vmem:[%s7264_s1 + $0x570] sm:$0xff]  ;;  %v202_v50 = vld [vmem:[%s7264_s1 + $0x578] sm:$0xff] }
 0x13c   :  { %v4668_v59 = vcombine.high %v197_v48, %v201_v49 }
 0x13e   :  { %3604 = vmatpush1.bf16.msra.mxu0 %v4611_v63  ;;  %3808 = vmatpush1.bf16.msra.mxu1 %v4613_v1  ;;  %v205_v63 = vld [vmem:[%s7264_s1 + $0x590] sm:$0xff] }
 0x13f   :  { %3605 = vmatprep.subr.bf16.mxu0 %v4620_v2  ;;  %3809 = vmatprep.subr.bf16.mxu1 %v4622_v3  ;;  %v209_v1 = vld [vmem:[%s7264_s1 + $0x5b0] sm:$0xff]  ;;  %v210_v2 = vld [vmem:[%s7264_s1 + $0x5b8] sm:$0xff]  ;;  %v4667_v3 = vcombine.low %v197_v48, %v201_v49 }
 0x140   :  { %v4676_v5 = vcombine.high %v205_v63, %v209_v1 }
 0x142   :  { %3606 = vmatpush1.bf16.msra.mxu0 %v4619_v6  ;;  %3810 = vmatpush1.bf16.msra.mxu1 %v4621_v8  ;;  %v217_v6 = vld [vmem:[%s7264_s1 + $0x5f0] sm:$0xff]  ;;  %v214_v8 = vld [vmem:[%s7264_s1 + $0x5d8] sm:$0xff] }
 0x143   :  { %3626 = vmatprep.subr.bf16.mxu0 %v4628_v9  ;;  %3830 = vmatprep.subr.bf16.mxu1 %v4630_v10  ;;  %v218_v9 = vld [vmem:[%s7264_s1 + $0x5f8] sm:$0xff]  ;;  %v4675_v10 = vcombine.low %v205_v63, %v209_v1  ;;  %v4684_v12 = vcombine.high %v213_v56, %v217_v6 }
 0x144   :  { %v4686_v13 = vcombine.high %v214_v8, %v218_v9  ;;  %v4685_v21 = vcombine.low %v214_v8, %v218_v9  ;;  %v269_v9 = vld [vmem:[%s7264_s1 + $0x790] sm:$0xff] }
 0x145   :  { %3608 = vmatmul.mubr.bf16.vlgmr.msra.gmra.mrb[8].mxu0 %v5509_v14  ;;  %3812 = vmatmul.mubr.bf16.vlgmr.msra.gmra.mrb[8].mxu1 %v5509_v14  ;;  %v182_v14 = vld [vmem:[%s7264_s1 + $0x4d8] sm:$0xff] }
 0x146   :  { %3627 = vmatpush1.bf16.msra.mxu0 %v4627_v16  ;;  %3831 = vmatpush1.bf16.msra.mxu1 %v4629_v17  ;;  %v4654_v39 = vcombine.high %v182_v14, %v186_v36  ;;  %v4653_v45 = vcombine.low %v182_v14, %v186_v36  ;;  %v225_v16 = vld [vmem:[%s7264_s1 + $0x630] sm:$0xff]  ;;  %v222_v17 = vld [vmem:[%s7264_s1 + $0x618] sm:$0xff] }
 0x147   :  { %3628 = vmatprep.subr.bf16.mxu0 %v4636_v18  ;;  %3832 = vmatprep.subr.bf16.mxu1 %v4638_v54  ;;  %v226_v18 = vld [vmem:[%s7264_s1 + $0x638] sm:$0xff]  ;;  %v4683_v54 = vcombine.low %v213_v56, %v217_v6  ;;  %v4692_v23 = vcombine.high %v221_v15, %v225_v16  ;;  %v237_v36 = vld [vmem:[%s7264_s1 + $0x690] sm:$0xff] }
 0x148   :  { %3617 = vmatprep.mubr.bf16.mxu0 %v5526_v22  ;;  %3821 = vmatprep.mubr.bf16.mxu1 %v5526_v22  ;;  %v190_v22 = vld [vmem:[%s7264_s1 + $0x518] sm:$0xff]  ;;  %v4694_v24 = vcombine.high %v222_v17, %v226_v18  ;;  %v4693_v31 = vcombine.low %v222_v17, %v226_v18  ;;  %v277_v18 = vld [vmem:[%s7264_s1 + $0x7d0] sm:$0xff] }
 0x149   :  { %v4662_v47 = vcombine.high %v190_v22, %v194_v44  ;;  %v4661_v57 = vcombine.low %v190_v22, %v194_v44  ;;  %v245_v44 = vld [vmem:[%s7264_s1 + $0x6d0] sm:$0xff] }
 0x14a   :  { %3629 = vmatpush1.bf16.msra.mxu0 %v4635_v58  ;;  %3833 = vmatpush1.bf16.msra.mxu1 %v4637_v26  ;;  %v233_v58 = vld [vmem:[%s7264_s1 + $0x670] sm:$0xff]  ;;  %v230_v26 = vld [vmem:[%s7264_s1 + $0x658] sm:$0xff] }
 0x14b   :  { %3630 = vmatprep.subr.bf16.mxu0 %v4644_v28  ;;  %3834 = vmatprep.subr.bf16.mxu1 %v4646_v30  ;;  %v234_v28 = vld [vmem:[%s7264_s1 + $0x678] sm:$0xff]  ;;  %v4691_v30 = vcombine.low %v221_v15, %v225_v16  ;;  %v4700_v32 = vcombine.high %v229_v25, %v233_v58 }
 0x14c   :  { %v4702_v14 = vcombine.high %v230_v26, %v234_v28  ;;  %v4701_v41 = vcombine.low %v230_v26, %v234_v28  ;;  %v285_v28 = vld [vmem:[%s7264_s1 + $0x810] sm:$0xff] }
 0x14d   :  { %3618 = vmatmul.mubr.bf16.gmra.mrb[12].mxu0 %v5550_v33  ;;  %3822 = vmatmul.mubr.bf16.gmra.mrb[12].mxu1 %v5550_v33  ;;  %v198_v33 = vld [vmem:[%s7264_s1 + $0x558] sm:$0xff] }
 0x14e   :  { %3631 = vmatpush1.bf16.msra.mxu0 %v4643_v37  ;;  %3835 = vmatpush1.bf16.msra.mxu1 %v4645_v34  ;;  %v4670_v60 = vcombine.high %v198_v33, %v202_v50  ;;  %v4669_v4 = vcombine.low %v198_v33, %v202_v50  ;;  %v241_v37 = vld [vmem:[%s7264_s1 + $0x6b0] sm:$0xff]  ;;  %v238_v34 = vld [vmem:[%s7264_s1 + $0x698] sm:$0xff] }
 0x14f   :  { %3632 = vmatprep.subr.bf16.mxu0 %v4652_v35  ;;  %3836 = vmatprep.subr.bf16.mxu1 %v4654_v39  ;;  %v242_v35 = vld [vmem:[%s7264_s1 + $0x6b8] sm:$0xff]  ;;  %v4699_v39 = vcombine.low %v229_v25, %v233_v58  ;;  %v4708_v43 = vcombine.high %v237_v36, %v241_v37  ;;  %v253_v50 = vld [vmem:[%s7264_s1 + $0x710] sm:$0xff] }
 0x150   :  { %3658 = vmatprep.mubr.bf16.mxu0 %v5570_v42  ;;  %3862 = vmatprep.mubr.bf16.mxu1 %v5570_v42  ;;  %v206_v42 = vld [vmem:[%s7264_s1 + $0x598] sm:$0xff]  ;;  %v4710_v22 = vcombine.high %v238_v34, %v242_v35  ;;  %v4709_v48 = vcombine.low %v238_v34, %v242_v35  ;;  %v293_v35 = vld [vmem:[%s7264_s1 + $0x850] sm:$0xff] }
 0x151   :  { %v4678_v55 = vcombine.high %v206_v42, %v210_v2  ;;  %v4677_v11 = vcombine.low %v206_v42, %v210_v2  ;;  %v261_v2 = vld [vmem:[%s7264_s1 + $0x750] sm:$0xff] }
 0x152   :  { %3633 = vmatpush1.bf16.msra.mxu0 %v4651_v20  ;;  %3837 = vmatpush1.bf16.msra.mxu1 %v4653_v45  ;;  %v249_v20 = vld [vmem:[%s7264_s1 + $0x6f0] sm:$0xff]  ;;  %v246_v45 = vld [vmem:[%s7264_s1 + $0x6d8] sm:$0xff] }
 0x153   :  { %3634 = vmatprep.subr.bf16.mxu0 %v4660_v46  ;;  %3838 = vmatprep.subr.bf16.mxu1 %v4662_v47  ;;  %v250_v46 = vld [vmem:[%s7264_s1 + $0x6f8] sm:$0xff]  ;;  %v4707_v47 = vcombine.low %v237_v36, %v241_v37  ;;  %v4716_v49 = vcombine.high %v245_v44, %v249_v20 }
 0x154   :  { %v4718_v33 = vcombine.high %v246_v45, %v250_v46  ;;  %v4717_v63 = vcombine.low %v246_v45, %v250_v46  ;;  %v301_v46 = vld [vmem:[%s7264_s1 + $0x890] sm:$0xff] }
 0x156   :  { %3635 = vmatpush1.bf16.msra.mxu0 %v4659_v51  ;;  %3839 = vmatpush1.bf16.msra.mxu1 %v4661_v57  ;;  %v257_v51 = vld [vmem:[%s7264_s1 + $0x730] sm:$0xff]  ;;  %v254_v57 = vld [vmem:[%s7264_s1 + $0x718] sm:$0xff] }
 0x157   :  { %3636 = vmatprep.subr.bf16.mxu0 %v4668_v59  ;;  %3840 = vmatprep.subr.bf16.mxu1 %v4670_v60  ;;  %v258_v59 = vld [vmem:[%s7264_s1 + $0x738] sm:$0xff]  ;;  %v4715_v60 = vcombine.low %v245_v44, %v249_v20  ;;  %v4724_v1 = vcombine.high %v253_v50, %v257_v51 }
 0x158   :  { %v4726_v42 = vcombine.high %v254_v57, %v258_v59  ;;  %v4725_v56 = vcombine.low %v254_v57, %v258_v59  ;;  %v309_v59 = vld [vmem:[%s7264_s1 + $0x8d0] sm:$0xff] }
 0x15a   :  { %3637 = vmatpush1.bf16.msra.mxu0 %v4667_v3  ;;  %3841 = vmatpush1.bf16.msra.mxu1 %v4669_v4  ;;  %v265_v3 = vld [vmem:[%s7264_s1 + $0x770] sm:$0xff]  ;;  %v262_v4 = vld [vmem:[%s7264_s1 + $0x758] sm:$0xff] }
 0x15b   :  { %3638 = vmatprep.subr.bf16.mxu0 %v4676_v5  ;;  %3842 = vmatprep.subr.bf16.mxu1 %v4678_v55  ;;  %v266_v5 = vld [vmem:[%s7264_s1 + $0x778] sm:$0xff]  ;;  %v4723_v55 = vcombine.low %v253_v50, %v257_v51  ;;  %v4732_v6 = vcombine.high %v261_v2, %v265_v3 }
 0x15c   :  { %v4734_v8 = vcombine.high %v262_v4, %v266_v5  ;;  %v4733_v15 = vcombine.low %v262_v4, %v266_v5  ;;  %v317_v4 = vld [vmem:[%s7264_s1 + $0x910] sm:$0xff] }
 0x15d   :  { %v321_v5 = vld [vmem:[%s7264_s1 + $0x930] sm:$0xff] }
 0x15e   :  { %3639 = vmatpush1.bf16.msra.mxu0 %v4675_v10  ;;  %3843 = vmatpush1.bf16.msra.mxu1 %v4677_v11  ;;  %v273_v10 = vld [vmem:[%s7264_s1 + $0x7b0] sm:$0xff]  ;;  %v270_v11 = vld [vmem:[%s7264_s1 + $0x798] sm:$0xff] }
 0x15f   :  { %3640 = vmatprep.subr.bf16.mxu0 %v4684_v12  ;;  %3844 = vmatprep.subr.bf16.mxu1 %v4686_v13  ;;  %v274_v12 = vld [vmem:[%s7264_s1 + $0x7b8] sm:$0xff]  ;;  %v4731_v13 = vcombine.low %v261_v2, %v265_v3  ;;  %v4740_v16 = vcombine.high %v269_v9, %v273_v10 }
 0x160   :  { %v4742_v17 = vcombine.high %v270_v11, %v274_v12  ;;  %v4741_v25 = vcombine.low %v270_v11, %v274_v12  ;;  %v326_v12 = vld [vmem:[%s7264_s1 + $0x958] sm:$0xff] }
 0x162   :  { %3641 = vmatpush1.bf16.msra.mxu0 %v4683_v54  ;;  %3845 = vmatpush1.bf16.msra.mxu1 %v4685_v21  ;;  %v281_v54 = vld [vmem:[%s7264_s1 + $0x7f0] sm:$0xff]  ;;  %v278_v21 = vld [vmem:[%s7264_s1 + $0x7d8] sm:$0xff] }
 0x163   :  { %3642 = vmatprep.subr.bf16.mxu0 %v4692_v23  ;;  %3846 = vmatprep.subr.bf16.mxu1 %v4694_v24  ;;  %v282_v23 = vld [vmem:[%s7264_s1 + $0x7f8] sm:$0xff]  ;;  %v4739_v24 = vcombine.low %v269_v9, %v273_v10  ;;  %v4748_v58 = vcombine.high %v277_v18, %v281_v54  ;;  %v4788_v9 = vcombine.high %v317_v4, %v321_v5  ;;  %v329_v10 = vld [vmem:[%s7264_s1 + $0x970] sm:$0xff] }
 0x164   :  { %v4750_v26 = vcombine.high %v278_v21, %v282_v23  ;;  %v4749_v36 = vcombine.low %v278_v21, %v282_v23  ;;  %v338_v21 = vld [vmem:[%s7264_s1 + $0x9b8] sm:$0xff] }
 0x166   :  { %3643 = vmatpush1.bf16.msra.mxu0 %v4691_v30  ;;  %3847 = vmatpush1.bf16.msra.mxu1 %v4693_v31  ;;  %v289_v30 = vld [vmem:[%s7264_s1 + $0x830] sm:$0xff]  ;;  %v286_v31 = vld [vmem:[%s7264_s1 + $0x818] sm:$0xff] }
 0x167   :  { %3644 = vmatprep.subr.bf16.mxu0 %v4700_v32  ;;  %3848 = vmatprep.subr.bf16.mxu1 %v4702_v14  ;;  %v290_v32 = vld [vmem:[%s7264_s1 + $0x838] sm:$0xff]  ;;  %v4747_v14 = vcombine.low %v277_v18, %v281_v54  ;;  %v4756_v37 = vcombine.high %v285_v28, %v289_v30  ;;  %v337_v18 = vld [vmem:[%s7264_s1 + $0x9b0] sm:$0xff] }
 0x168   :  { %v4758_v34 = vcombine.high %v286_v31, %v290_v32  ;;  %v4757_v44 = vcombine.low %v286_v31, %v290_v32 }
 0x16a   :  { %3645 = vmatpush1.bf16.msra.mxu0 %v4699_v39  ;;  %3849 = vmatpush1.bf16.msra.mxu1 %v4701_v41  ;;  %v297_v39 = vld [vmem:[%s7264_s1 + $0x870] sm:$0xff]  ;;  %v294_v41 = vld [vmem:[%s7264_s1 + $0x858] sm:$0xff] }
 0x16b   :  { %3646 = vmatprep.subr.bf16.mxu0 %v4708_v43  ;;  %3850 = vmatprep.subr.bf16.mxu1 %v4710_v22  ;;  %v298_v43 = vld [vmem:[%s7264_s1 + $0x878] sm:$0xff]  ;;  %v4755_v22 = vcombine.low %v285_v28, %v289_v30  ;;  %v4764_v20 = vcombine.high %v293_v35, %v297_v39 }
 0x16c   :  { %v4766_v45 = vcombine.high %v294_v41, %v298_v43  ;;  %v4765_v50 = vcombine.low %v294_v41, %v298_v43  ;;  %v342_v28 = vld [vmem:[%s7264_s1 + $0x9d8] sm:$0xff] }
 0x16d   :  { %v346_v30 = vld [vmem:[%s7264_s1 + $0x9f8] sm:$0xff] }
 0x16e   :  { %3647 = vmatpush1.bf16.msra.mxu0 %v4707_v47  ;;  %3851 = vmatpush1.bf16.msra.mxu1 %v4709_v48  ;;  %v305_v47 = vld [vmem:[%s7264_s1 + $0x8b0] sm:$0xff]  ;;  %v302_v48 = vld [vmem:[%s7264_s1 + $0x898] sm:$0xff]  ;;  %v4814_v41 = vcombine.high %v342_v28, %v346_v30 }
 0x16f   :  { %3648 = vmatprep.subr.bf16.mxu0 %v4716_v49  ;;  %3852 = vmatprep.subr.bf16.mxu1 %v4718_v33  ;;  %v306_v49 = vld [vmem:[%s7264_s1 + $0x8b8] sm:$0xff]  ;;  %v4763_v33 = vcombine.low %v293_v35, %v297_v39  ;;  %v4772_v51 = vcombine.high %v301_v46, %v305_v47 }
 0x170   :  { %v4774_v57 = vcombine.high %v302_v48, %v306_v49  ;;  %v350_v35 = vld [vmem:[%s7264_s1 + $0xa18] sm:$0xff] }
 0x171   :  { %v354_v39 = vld [vmem:[%s7264_s1 + $0xa38] sm:$0xff] }
 0x172   :  { %3649 = vmatpush1.bf16.msra.mxu0 %v4715_v60  ;;  %3853 = vmatpush1.bf16.msra.mxu1 %v4717_v63  ;;  %v313_v60 = vld [vmem:[%s7264_s1 + $0x8f0] sm:$0xff]  ;;  %v314_v63 = vld [vmem:[%s7264_s1 + $0x8f8] sm:$0xff] }
 0x173   :  { %3650 = vmatprep.subr.bf16.mxu0 %v4724_v1  ;;  %3854 = vmatprep.subr.bf16.mxu1 %v4726_v42  ;;  %v4771_v1 = vcombine.low %v301_v46, %v305_v47  ;;  %v4773_v42 = vcombine.low %v302_v48, %v306_v49  ;;  %v4780_v2 = vcombine.high %v309_v59, %v313_v60  ;;  %v358_v46 = vld [vmem:[%s7264_s1 + $0xa58] sm:$0xff] }
 0x174   :  { %v362_v47 = vld [vmem:[%s7264_s1 + $0xa78] sm:$0xff]  ;;  %v4822_v48 = vcombine.high %v350_v35, %v354_v39 }
 0x176   :  { %3651 = vmatpush1.bf16.msra.mxu0 %v4723_v55  ;;  %3855 = vmatpush1.bf16.msra.mxu1 %v4725_v56  ;;  %v322_v55 = vld [vmem:[%s7264_s1 + $0x938] sm:$0xff]  ;;  %v4779_v56 = vcombine.low %v309_v59, %v313_v60 }
 0x177   :  { %3652 = vmatprep.subr.bf16.mxu0 %v4732_v6  ;;  %3856 = vmatprep.subr.bf16.mxu1 %v4734_v8  ;;  %v325_v6 = vld [vmem:[%s7264_s1 + $0x950] sm:$0xff]  ;;  %v366_v59 = vld [vmem:[%s7264_s1 + $0xa98] sm:$0xff] }
 0x178   :  { %v4795_v23 = vcombine.low %v325_v6, %v329_v10  ;;  %v370_v60 = vld [vmem:[%s7264_s1 + $0xab8] sm:$0xff] }
 0x17a   :  { %3653 = vmatpush1.bf16.msra.mxu0 %v4731_v13  ;;  %3857 = vmatpush1.bf16.msra.mxu1 %v4733_v15  ;;  %v4787_v13 = vcombine.low %v317_v4, %v321_v5  ;;  %v333_v15 = vld [vmem:[%s7264_s1 + $0x990] sm:$0xff]  ;;  %v374_v5 = vld [vmem:[%s7264_s1 + $0xad8] sm:$0xff] }
 0x17b   :  { %3654 = vmatprep.subr.bf16.mxu0 %v4740_v16  ;;  %3858 = vmatprep.subr.bf16.mxu1 %v4742_v17  ;;  %v4796_v17 = vcombine.high %v325_v6, %v329_v10  ;;  %v4803_v32 = vcombine.low %v333_v15, %v337_v18  ;;  %v377_v4 = vld [vmem:[%s7264_s1 + $0xaf0] sm:$0xff] }
 0x17c   :  { %v385_v10 = vld [vmem:[%s7264_s1 + $0xb30] sm:$0xff] }
 0x17e   :  { %3655 = vmatpush1.bf16.msra.mxu0 %v4739_v24  ;;  %3859 = vmatpush1.bf16.msra.mxu1 %v4741_v25  ;;  %v341_v24 = vld [vmem:[%s7264_s1 + $0x9d0] sm:$0xff] }
 0x17f   :  { %3656 = vmatprep.subr.bf16.mxu0 %v4748_v58  ;;  %3860 = vmatprep.subr.bf16.mxu1 %v4750_v26  ;;  %v345_v25 = vld [vmem:[%s7264_s1 + $0x9f0] sm:$0xff]  ;;  %v4804_v26 = vcombine.high %v333_v15, %v337_v18 }
 0x180   :  { %v4811_v43 = vcombine.low %v341_v24, %v345_v25  ;;  %v393_v18 = vld [vmem:[%s7264_s1 + $0xb70] sm:$0xff] }
 0x182   :  { %3657 = vmatpush1.bf16.msra.mxu0 %v4747_v14  ;;  %3861 = vmatpush1.bf16.msra.mxu1 %v4749_v36  ;;  %v349_v14 = vld [vmem:[%s7264_s1 + $0xa10] sm:$0xff] }
 0x183   :  { %3677 = vmatprep.subr.bf16.mxu0 %v4756_v37  ;;  %3881 = vmatprep.subr.bf16.mxu1 %v4758_v34  ;;  %v353_v36 = vld [vmem:[%s7264_s1 + $0xa30] sm:$0xff]  ;;  %v4812_v34 = vcombine.high %v341_v24, %v345_v25 }
 0x184   :  { %v4819_v49 = vcombine.low %v349_v14, %v353_v36 }
 0x185   :  { %3659 = vmatmul.mubr.bf16.vlgmr.msra.gmra.mrb[8].mxu0 %v5734_v29  ;;  %3863 = vmatmul.mubr.bf16.vlgmr.msra.gmra.mrb[8].mxu1 %v5734_v29  ;;  %v310_v29 = vld [vmem:[%s7264_s1 + $0x8d8] sm:$0xff] }
 0x186   :  { %3678 = vmatpush1.bf16.msra.mxu0 %v4755_v22  ;;  %3882 = vmatpush1.bf16.msra.mxu1 %v4757_v44  ;;  %v4782_v3 = vcombine.high %v310_v29, %v314_v63  ;;  %v4781_v8 = vcombine.low %v310_v29, %v314_v63  ;;  %v357_v22 = vld [vmem:[%s7264_s1 + $0xa50] sm:$0xff]  ;;  %v4830_v29 = vcombine.high %v358_v46, %v362_v47 }
 0x187   :  { %3679 = vmatprep.subr.bf16.mxu0 %v4764_v20  ;;  %3883 = vmatprep.subr.bf16.mxu1 %v4766_v45  ;;  %v361_v44 = vld [vmem:[%s7264_s1 + $0xa70] sm:$0xff]  ;;  %v4813_v20 = vcombine.low %v342_v28, %v346_v30  ;;  %v4820_v45 = vcombine.high %v349_v14, %v353_v36  ;;  %v398_v28 = vld [vmem:[%s7264_s1 + $0xb98] sm:$0xff] }
 0x188   :  { %3668 = vmatprep.mubr.bf16.mxu0 %v5751_v40  ;;  %3872 = vmatprep.mubr.bf16.mxu1 %v5751_v40  ;;  %v318_v40 = vld [vmem:[%s7264_s1 + $0x918] sm:$0xff]  ;;  %v4827_v63 = vcombine.low %v357_v22, %v361_v44 }
 0x189   :  { %v4790_v11 = vcombine.high %v318_v40, %v322_v55  ;;  %v4789_v16 = vcombine.low %v318_v40, %v322_v55  ;;  %v378_v40 = vld [vmem:[%s7264_s1 + $0xaf8] sm:$0xff] }
 0x18a   :  { %3680 = vmatpush1.bf16.msra.mxu0 %v4763_v33  ;;  %3884 = vmatpush1.bf16.msra.mxu1 %v4765_v50  ;;  %v365_v33 = vld [vmem:[%s7264_s1 + $0xa90] sm:$0xff]  ;;  %v402_v30 = vld [vmem:[%s7264_s1 + $0xbb8] sm:$0xff] }
 0x18b   :  { %3681 = vmatprep.subr.bf16.mxu0 %v4772_v51  ;;  %3885 = vmatprep.subr.bf16.mxu1 %v4774_v57  ;;  %v369_v50 = vld [vmem:[%s7264_s1 + $0xab0] sm:$0xff]  ;;  %v4821_v51 = vcombine.low %v350_v35, %v354_v39  ;;  %v4828_v57 = vcombine.high %v357_v22, %v361_v44  ;;  %v4870_v36 = vcombine.high %v398_v28, %v402_v30  ;;  %v406_v35 = vld [vmem:[%s7264_s1 + $0xbd8] sm:$0xff] }
 0x18c   :  { %v4835_v55 = vcombine.low %v365_v33, %v369_v50  ;;  %v410_v39 = vld [vmem:[%s7264_s1 + $0xbf8] sm:$0xff] }
 0x18d   :  { %3669 = vmatmul.mubr.bf16.gmra.mrb[12].mxu0 %v5775_v52  ;;  %3873 = vmatmul.mubr.bf16.gmra.mrb[12].mxu1 %v5775_v52  ;;  %v330_v52 = vld [vmem:[%s7264_s1 + $0x978] sm:$0xff]  ;;  %v4878_v44 = vcombine.high %v406_v35, %v410_v39 }
 0x18e   :  { %3682 = vmatpush1.bf16.msra.mxu0 %v4771_v1  ;;  %3886 = vmatpush1.bf16.msra.mxu1 %v4773_v42  ;;  %v4798_v54 = vcombine.high %v326_v12, %v330_v52  ;;  %v4797_v58 = vcombine.low %v326_v12, %v330_v52  ;;  %v4829_v1 = vcombine.low %v358_v46, %v362_v47  ;;  %v386_v12 = vld [vmem:[%s7264_s1 + $0xb38] sm:$0xff] }
 0x18f   :  { %3683 = vmatprep.subr.bf16.mxu0 %v4780_v2  ;;  %3887 = vmatprep.subr.bf16.mxu1 %v4782_v3  ;;  %v4836_v42 = vcombine.high %v365_v33, %v369_v50  ;;  %v4838_v2 = vcombine.high %v366_v59, %v370_v60  ;;  %v373_v3 = vld [vmem:[%s7264_s1 + $0xad0] sm:$0xff]  ;;  %v414_v46 = vld [vmem:[%s7264_s1 + $0xc18] sm:$0xff] }
 0x190   :  { %3709 = vmatprep.mubr.bf16.mxu0 %v5795_v0  ;;  %3913 = vmatprep.mubr.bf16.mxu1 %v5795_v0  ;;  %v334_v0 = vld [vmem:[%s7264_s1 + $0x998] sm:$0xff]  ;;  %v4844_v6 = vcombine.high %v373_v3, %v377_v4  ;;  %v4843_v52 = vcombine.low %v373_v3, %v377_v4  ;;  %v433_v3 = vld [vmem:[%s7264_s1 + $0xcb0] sm:$0xff] }
 0x191   :  { %v4806_v31 = vcombine.high %v334_v0, %v338_v21  ;;  %v4805_v37 = vcombine.low %v334_v0, %v338_v21  ;;  %v394_v0 = vld [vmem:[%s7264_s1 + $0xb78] sm:$0xff] }
 0x192   :  { %3684 = vmatpush1.bf16.msra.mxu0 %v4779_v56  ;;  %3888 = vmatpush1.bf16.msra.mxu1 %v4781_v8  ;;  %v4837_v56 = vcombine.low %v366_v59, %v370_v60  ;;  %v4846_v8 = vcombine.high %v374_v5, %v378_v40  ;;  %v418_v47 = vld [vmem:[%s7264_s1 + $0xc38] sm:$0xff] }
 0x193   :  { %3685 = vmatprep.subr.bf16.mxu0 %v4788_v9  ;;  %3889 = vmatprep.subr.bf16.mxu1 %v4790_v11  ;;  %v381_v9 = vld [vmem:[%s7264_s1 + $0xb10] sm:$0xff]  ;;  %v382_v11 = vld [vmem:[%s7264_s1 + $0xb18] sm:$0xff]  ;;  %v4886_v50 = vcombine.high %v414_v46, %v418_v47 }
 0x194   :  { %v4852_v15 = vcombine.high %v381_v9, %v385_v10  ;;  %v4851_v21 = vcombine.low %v381_v9, %v385_v10  ;;  %v422_v59 = vld [vmem:[%s7264_s1 + $0xc58] sm:$0xff]  ;;  %v441_v9 = vld [vmem:[%s7264_s1 + $0xcf0] sm:$0xff] }
 0x195   :  { %v426_v60 = vld [vmem:[%s7264_s1 + $0xc78] sm:$0xff] }
 0x196   :  { %3686 = vmatpush1.bf16.msra.mxu0 %v4787_v13  ;;  %3890 = vmatpush1.bf16.msra.mxu1 %v4789_v16  ;;  %v4845_v13 = vcombine.low %v374_v5, %v378_v40  ;;  %v4854_v16 = vcombine.high %v382_v11, %v386_v12  ;;  %v430_v4 = vld [vmem:[%s7264_s1 + $0xc98] sm:$0xff] }
 0x197   :  { %3687 = vmatprep.subr.bf16.mxu0 %v4796_v17  ;;  %3891 = vmatprep.subr.bf16.mxu1 %v4798_v54  ;;  %v389_v17 = vld [vmem:[%s7264_s1 + $0xb50] sm:$0xff]  ;;  %v390_v54 = vld [vmem:[%s7264_s1 + $0xb58] sm:$0xff] }
 0x198   :  { %v4860_v24 = vcombine.high %v389_v17, %v393_v18  ;;  %v4862_v25 = vcombine.high %v390_v54, %v394_v0  ;;  %v434_v5 = vld [vmem:[%s7264_s1 + $0xcb8] sm:$0xff] }
 0x199   :  { %v442_v10 = vld [vmem:[%s7264_s1 + $0xcf8] sm:$0xff] }
 0x19a   :  { %3688 = vmatpush1.bf16.msra.mxu0 %v4795_v23  ;;  %3892 = vmatpush1.bf16.msra.mxu1 %v4797_v58  ;;  %v4853_v23 = vcombine.low %v382_v11, %v386_v12  ;;  %v397_v58 = vld [vmem:[%s7264_s1 + $0xb90] sm:$0xff]  ;;  %v4901_v12 = vcombine.low %v430_v4, %v434_v5 }
 0x19b   :  { %3689 = vmatprep.subr.bf16.mxu0 %v4804_v26  ;;  %3893 = vmatprep.subr.bf16.mxu1 %v4806_v31  ;;  %v401_v26 = vld [vmem:[%s7264_s1 + $0xbb0] sm:$0xff]  ;;  %v4859_v31 = vcombine.low %v389_v17, %v393_v18  ;;  %v450_v17 = vld [vmem:[%s7264_s1 + $0xd38] sm:$0xff] }
 0x19c   :  { %v4868_v14 = vcombine.high %v397_v58, %v401_v26 }
 0x19e   :  { %3690 = vmatpush1.bf16.msra.mxu0 %v4803_v32  ;;  %3894 = vmatpush1.bf16.msra.mxu1 %v4805_v37  ;;  %v4861_v32 = vcombine.low %v390_v54, %v394_v0  ;;  %v405_v37 = vld [vmem:[%s7264_s1 + $0xbd0] sm:$0xff] }
 0x19f   :  { %3691 = vmatprep.subr.bf16.mxu0 %v4812_v34  ;;  %3895 = vmatprep.subr.bf16.mxu1 %v4814_v41  ;;  %v409_v34 = vld [vmem:[%s7264_s1 + $0xbf0] sm:$0xff]  ;;  %v4867_v41 = vcombine.low %v397_v58, %v401_v26 }
 0x1a0   :  { %v4876_v22 = vcombine.high %v405_v37, %v409_v34 }
 0x1a2   :  { %3692 = vmatpush1.bf16.msra.mxu0 %v4811_v43  ;;  %3896 = vmatpush1.bf16.msra.mxu1 %v4813_v20  ;;  %v4869_v43 = vcombine.low %v398_v28, %v402_v30  ;;  %v413_v20 = vld [vmem:[%s7264_s1 + $0xc10] sm:$0xff] }
 0x1a3   :  { %3693 = vmatprep.subr.bf16.mxu0 %v4820_v45  ;;  %3897 = vmatprep.subr.bf16.mxu1 %v4822_v48  ;;  %v417_v45 = vld [vmem:[%s7264_s1 + $0xc30] sm:$0xff]  ;;  %v4875_v48 = vcombine.low %v405_v37, %v409_v34 }
 0x1a4   :  { %v4884_v33 = vcombine.high %v413_v20, %v417_v45 }
 0x1a6   :  { %3694 = vmatpush1.bf16.msra.mxu0 %v4819_v49  ;;  %3898 = vmatpush1.bf16.msra.mxu1 %v4821_v51  ;;  %v4877_v49 = vcombine.low %v406_v35, %v410_v39  ;;  %v421_v51 = vld [vmem:[%s7264_s1 + $0xc50] sm:$0xff] }
 0x1a7   :  { %3695 = vmatprep.subr.bf16.mxu0 %v4828_v57  ;;  %3899 = vmatprep.subr.bf16.mxu1 %v4830_v29  ;;  %v425_v57 = vld [vmem:[%s7264_s1 + $0xc70] sm:$0xff]  ;;  %v4883_v29 = vcombine.low %v413_v20, %v417_v45  ;;  %v470_v20 = vld [vmem:[%s7264_s1 + $0xdd8] sm:$0xff] }
 0x1a8   :  { %v4891_v40 = vcombine.low %v421_v51, %v425_v57  ;;  %v474_v45 = vld [vmem:[%s7264_s1 + $0xdf8] sm:$0xff] }
 0x1aa   :  { %3696 = vmatpush1.bf16.msra.mxu0 %v4827_v63  ;;  %3900 = vmatpush1.bf16.msra.mxu1 %v4829_v1  ;;  %v4885_v63 = vcombine.low %v414_v46, %v418_v47  ;;  %v4892_v1 = vcombine.high %v421_v51, %v425_v57 }
 0x1ab   :  { %3697 = vmatprep.subr.bf16.mxu0 %v4836_v42  ;;  %3901 = vmatprep.subr.bf16.mxu1 %v4838_v2  ;;  %v4894_v42 = vcombine.high %v422_v59, %v426_v60  ;;  %v429_v2 = vld [vmem:[%s7264_s1 + $0xc90] sm:$0xff] }
 0x1ac   :  { %v4899_v11 = vcombine.low %v429_v2, %v433_v3 }
 0x1ae   :  { %3698 = vmatpush1.bf16.msra.mxu0 %v4835_v55  ;;  %3902 = vmatpush1.bf16.msra.mxu1 %v4837_v56  ;;  %v4893_v55 = vcombine.low %v422_v59, %v426_v60  ;;  %v4900_v56 = vcombine.high %v429_v2, %v433_v3  ;;  %v4942_v59 = vcombine.high %v470_v20, %v474_v45  ;;  %v477_v60 = vld [vmem:[%s7264_s1 + $0xe10] sm:$0xff] }
 0x1af   :  { %3699 = vmatprep.subr.bf16.mxu0 %v4844_v6  ;;  %3903 = vmatprep.subr.bf16.mxu1 %v4846_v8  ;;  %v4902_v6 = vcombine.high %v430_v4, %v434_v5  ;;  %v437_v8 = vld [vmem:[%s7264_s1 + $0xcd0] sm:$0xff]  ;;  %v4941_v2 = vcombine.low %v470_v20, %v474_v45 }
 0x1b0   :  { %v4907_v18 = vcombine.low %v437_v8, %v441_v9  ;;  %v517_v45 = vld [vmem:[%s7264_s1 + $0xf50] sm:$0xff] }
 0x1b2   :  { %3700 = vmatpush1.bf16.msra.mxu0 %v4843_v52  ;;  %3904 = vmatpush1.bf16.msra.mxu1 %v4845_v13  ;;  %v4908_v52 = vcombine.high %v437_v8, %v441_v9  ;;  %v486_v8 = vld [vmem:[%s7264_s1 + $0xe58] sm:$0xff] }
 0x1b3   :  { %3701 = vmatprep.subr.bf16.mxu0 %v4852_v15  ;;  %3905 = vmatprep.subr.bf16.mxu1 %v4854_v16  ;;  %v445_v15 = vld [vmem:[%s7264_s1 + $0xd10] sm:$0xff]  ;;  %v490_v9 = vld [vmem:[%s7264_s1 + $0xe78] sm:$0xff] }
 0x1b4   :  { %v449_v16 = vld [vmem:[%s7264_s1 + $0xd30] sm:$0xff] }
 0x1b5   :  { %v4916_v0 = vcombine.high %v445_v15, %v449_v16  ;;  %v4915_v58 = vcombine.low %v445_v15, %v449_v16 }
 0x1b6   :  { %3702 = vmatpush1.bf16.msra.mxu0 %v4851_v21  ;;  %3906 = vmatpush1.bf16.msra.mxu1 %v4853_v23  ;;  %v453_v23 = vld [vmem:[%s7264_s1 + $0xd50] sm:$0xff] }
 0x1b7   :  { %3703 = vmatprep.subr.bf16.mxu0 %v4860_v24  ;;  %3907 = vmatprep.subr.bf16.mxu1 %v4862_v25  ;;  %v457_v24 = vld [vmem:[%s7264_s1 + $0xd70] sm:$0xff]  ;;  %v458_v25 = vld [vmem:[%s7264_s1 + $0xd78] sm:$0xff] }
 0x1b8   :  { %v4924_v28 = vcombine.high %v453_v23, %v457_v24 }
 0x1ba   :  { %3704 = vmatpush1.bf16.msra.mxu0 %v4859_v31  ;;  %3908 = vmatpush1.bf16.msra.mxu1 %v4861_v32  ;;  %v461_v31 = vld [vmem:[%s7264_s1 + $0xd90] sm:$0xff] }
 0x1bb   :  { %3705 = vmatprep.subr.bf16.mxu0 %v4868_v14  ;;  %3909 = vmatprep.subr.bf16.mxu1 %v4870_v36  ;;  %v465_v32 = vld [vmem:[%s7264_s1 + $0xdb0] sm:$0xff]  ;;  %v466_v14 = vld [vmem:[%s7264_s1 + $0xdb8] sm:$0xff]  ;;  %v4923_v36 = vcombine.low %v453_v23, %v457_v24  ;;  %v4957_v23 = vcombine.low %v486_v8, %v490_v9 }
 0x1bc   :  { %v4932_v34 = vcombine.high %v461_v31, %v465_v32 }
 0x1be   :  { %3706 = vmatpush1.bf16.msra.mxu0 %v4867_v41  ;;  %3910 = vmatpush1.bf16.msra.mxu1 %v4869_v43  ;;  %v469_v41 = vld [vmem:[%s7264_s1 + $0xdd0] sm:$0xff] }
 0x1bf   :  { %3707 = vmatprep.subr.bf16.mxu0 %v4876_v22  ;;  %3911 = vmatprep.subr.bf16.mxu1 %v4878_v44  ;;  %v473_v43 = vld [vmem:[%s7264_s1 + $0xdf0] sm:$0xff] }
 0x1c0   :  { %v4940_v51 = vcombine.high %v469_v41, %v473_v43 }
 0x1c2   :  { %3708 = vmatpush1.bf16.msra.mxu0 %v4875_v48  ;;  %3912 = vmatpush1.bf16.msra.mxu1 %v4877_v49  ;;  %v4931_v48 = vcombine.low %v461_v31, %v465_v32 }
 0x1c3   :  { %3728 = vmatprep.subr.bf16.mxu0 %v4884_v33  ;;  %3932 = vmatprep.subr.bf16.mxu1 %v4886_v50 }
 0x1c5   :  { %3710 = vmatmul.mubr.bf16.vlgmr.msra.gmra.mrb[8].mxu0 %v5959_v62  ;;  %3914 = vmatmul.mubr.bf16.vlgmr.msra.gmra.mrb[8].mxu1 %v5959_v62  ;;  %v438_v62 = vld [vmem:[%s7264_s1 + $0xcd8] sm:$0xff] }
 0x1c6   :  { %3729 = vmatpush1.bf16.msra.mxu0 %v4883_v29  ;;  %3933 = vmatpush1.bf16.msra.mxu1 %v4885_v63  ;;  %v4910_v13 = vcombine.high %v438_v62, %v442_v10  ;;  %v4909_v54 = vcombine.low %v438_v62, %v442_v10  ;;  %v481_v29 = vld [vmem:[%s7264_s1 + $0xe30] sm:$0xff]  ;;  %v478_v63 = vld [vmem:[%s7264_s1 + $0xe18] sm:$0xff] }
 0x1c7   :  { %3730 = vmatprep.subr.bf16.mxu0 %v4892_v1  ;;  %3934 = vmatprep.subr.bf16.mxu1 %v4894_v42  ;;  %v482_v1 = vld [vmem:[%s7264_s1 + $0xe38] sm:$0xff]  ;;  %v4939_v42 = vcombine.low %v469_v41, %v473_v43  ;;  %v4948_v3 = vcombine.high %v477_v60, %v481_v29 }
 0x1c8   :  { %3719 = vmatprep.mubr.bf16.mxu0 %v5976_v7  ;;  %3923 = vmatprep.mubr.bf16.mxu1 %v5976_v7  ;;  %v446_v7 = vld [vmem:[%s7264_s1 + $0xd18] sm:$0xff]  ;;  %v4950_v5 = vcombine.high %v478_v63, %v482_v1 }
 0x1c9   :  { %v4918_v21 = vcombine.high %v446_v7, %v450_v17  ;;  %v4917_v26 = vcombine.low %v446_v7, %v450_v17  ;;  %v4958_v7 = vcombine.high %v486_v8, %v490_v9  ;;  %v493_v17 = vld [vmem:[%s7264_s1 + $0xe90] sm:$0xff] }
 0x1ca   :  { %3731 = vmatpush1.bf16.msra.mxu0 %v4891_v40  ;;  %3935 = vmatpush1.bf16.msra.mxu1 %v4893_v55  ;;  %v485_v40 = vld [vmem:[%s7264_s1 + $0xe50] sm:$0xff] }
 0x1cb   :  { %3732 = vmatprep.subr.bf16.mxu0 %v4900_v56  ;;  %3936 = vmatprep.subr.bf16.mxu1 %v4902_v6  ;;  %v489_v55 = vld [vmem:[%s7264_s1 + $0xe70] sm:$0xff] }
 0x1cc   :  { %v4956_v15 = vcombine.high %v485_v40, %v489_v55  ;;  %v533_v9 = vld [vmem:[%s7264_s1 + $0xfd0] sm:$0xff] }
 0x1cd   :  { %3720 = vmatmul.mubr.bf16.gmra.mrb[12].mxu0 %v6000_v19  ;;  %3924 = vmatmul.mubr.bf16.gmra.mrb[12].mxu1 %v6000_v19  ;;  %v454_v19 = vld [vmem:[%s7264_s1 + $0xd58] sm:$0xff] }
 0x1ce   :  { %3733 = vmatpush1.bf16.msra.mxu0 %v4899_v11  ;;  %3937 = vmatpush1.bf16.msra.mxu1 %v4901_v12  ;;  %v4926_v30 = vcombine.high %v454_v19, %v458_v25  ;;  %v4925_v37 = vcombine.low %v454_v19, %v458_v25  ;;  %v4947_v11 = vcombine.low %v477_v60, %v481_v29  ;;  %v501_v25 = vld [vmem:[%s7264_s1 + $0xed0] sm:$0xff] }
 0x1cf   :  { %3734 = vmatprep.subr.bf16.mxu0 %v4908_v52  ;;  %3938 = vmatprep.subr.bf16.mxu1 %v4910_v13  ;;  %v4949_v13 = vcombine.low %v478_v63, %v482_v1  ;;  %v525_v1 = vld [vmem:[%s7264_s1 + $0xf90] sm:$0xff] }
 0x1d0   :  { %3760 = vmatprep.mubr.bf16.mxu0 %v6020_v27  ;;  %3964 = vmatprep.mubr.bf16.mxu1 %v6020_v27  ;;  %v462_v27 = vld [vmem:[%s7264_s1 + $0xd98] sm:$0xff] }
 0x1d1   :  { %v4934_v39 = vcombine.high %v462_v27, %v466_v14  ;;  %v4933_v50 = vcombine.low %v462_v27, %v466_v14  ;;  %v509_v14 = vld [vmem:[%s7264_s1 + $0xf10] sm:$0xff] }
 0x1d2   :  { %3735 = vmatpush1.bf16.msra.mxu0 %v4907_v18  ;;  %3939 = vmatpush1.bf16.msra.mxu1 %v4909_v54  ;;  %v497_v18 = vld [vmem:[%s7264_s1 + $0xeb0] sm:$0xff]  ;;  %v494_v54 = vld [vmem:[%s7264_s1 + $0xe98] sm:$0xff] }
 0x1d3   :  { %3736 = vmatprep.subr.bf16.mxu0 %v4916_v0  ;;  %3940 = vmatprep.subr.bf16.mxu1 %v4918_v21  ;;  %v498_v0 = vld [vmem:[%s7264_s1 + $0xeb8] sm:$0xff]  ;;  %v4955_v21 = vcombine.low %v485_v40, %v489_v55  ;;  %v4964_v24 = vcombine.high %v493_v17, %v497_v18 }
 0x1d4   :  { %v4966_v19 = vcombine.high %v494_v54, %v498_v0  ;;  %v4965_v31 = vcombine.low %v494_v54, %v498_v0  ;;  %v5200_v54 = vld [vmem:[%s7266_s2 + $0xc0] sm:$0xff]  }
 0x1d5   :  { %v5201_v0 = vld [vmem:[%s7266_s2] sm:$0xff]  }
 0x1d6   :  { %3737 = vmatpush1.bf16.msra.mxu0 %v4915_v58  ;;  %3941 = vmatpush1.bf16.msra.mxu1 %v4917_v26  ;;  %v505_v58 = vld [vmem:[%s7264_s1 + $0xef0] sm:$0xff]  ;;  %v502_v26 = vld [vmem:[%s7264_s1 + $0xed8] sm:$0xff] }
 0x1d7   :  { %3738 = vmatprep.subr.bf16.mxu0 %v4924_v28  ;;  %3942 = vmatprep.subr.bf16.mxu1 %v4926_v30  ;;  %v506_v28 = vld [vmem:[%s7264_s1 + $0xef8] sm:$0xff]  ;;  %v4963_v30 = vcombine.low %v493_v17, %v497_v18  ;;  %v4972_v32 = vcombine.high %v501_v25, %v505_v58  ;;  %v5199_v18 = vld [vmem:[%s7266_s2 + $0x40] sm:$0xff]  }
 0x1d8   :  { %v6867_v35 = vpop.f32.mrb[0].mxu0  ;;  %v6875_v22 = vpop.f32.mrb[0].mxu1  ;;  %v4974_v27 = vcombine.high %v502_v26, %v506_v28  ;;  %v4973_v41 = vcombine.low %v502_v26, %v506_v28  ;;  %v5210_v26 = vld [vmem:[%s7266_s2 + $0x90] sm:$0xff]   ;;  %v5212_v28 = vld [vmem:[%s7266_s2 + $0xd8] sm:$0xff]  }
 0x1d9   :  { %v6877_v44 = vpop.f32.mrb[1].mxu0  ;;  %v6885_v46 = vpop.f32.mrb[1].mxu1 }
 0x1da   :  { %v6887_v47 = vpop.f32.mrb[2].mxu0  ;;  %3739 = vmatpush1.bf16.msra.mxu0 %v4923_v36  ;;  %v6889_v49 = vpop.f32.mrb[2].mxu1  ;;  %3943 = vmatpush1.bf16.msra.mxu1 %v4925_v37  ;;  %v513_v36 = vld [vmem:[%s7264_s1 + $0xf30] sm:$0xff]  ;;  %v510_v37 = vld [vmem:[%s7264_s1 + $0xf18] sm:$0xff] }
 0x1db   :  { %v6891_v33 = vpop.f32.mrb[3].mxu0  ;;  %3740 = vmatprep.subr.bf16.mxu0 %v4932_v34  ;;  %v6893_v57 = vpop.f32.mrb[3].mxu1  ;;  %3944 = vmatprep.subr.bf16.mxu1 %v4934_v39  ;;  %v514_v34 = vld [vmem:[%s7264_s1 + $0xf38] sm:$0xff]  ;;  %v4971_v39 = vcombine.low %v501_v25, %v505_v58  ;;  %v4980_v43 = vcombine.high %v509_v14, %v513_v36  ;;  %v5206_v25 = vld [vmem:[%s7266_s2 + $0x88] sm:$0xff]   ;;  %v5209_v58 = vld [vmem:[%s7266_s2 + $0x10] sm:$0xff]  }
 0x1dc   :  { %v4982_v20 = vcombine.high %v510_v37, %v514_v34  ;;  %v4981_v60 = vcombine.low %v510_v37, %v514_v34  ;;  %v5219_v37 = vld [vmem:[%s7266_s2 + $0x68] sm:$0xff]  }
 0x1dd   :  { %v5220_v34 = vld [vmem:[%s7266_s2 + $0xe8] sm:$0xff]  }
 0x1de   :  { %3741 = vmatpush1.bf16.msra.mxu0 %v4931_v48  ;;  %3945 = vmatpush1.bf16.msra.mxu1 %v4933_v50  ;;  %v521_v48 = vld [vmem:[%s7264_s1 + $0xf70] sm:$0xff]  ;;  %v518_v50 = vld [vmem:[%s7264_s1 + $0xf58] sm:$0xff] }
 0x1df   :  { %3742 = vmatprep.subr.bf16.mxu0 %v4940_v51  ;;  %3946 = vmatprep.subr.bf16.mxu1 %v4942_v59  ;;  %v522_v51 = vld [vmem:[%s7264_s1 + $0xf78] sm:$0xff]  ;;  %v4979_v59 = vcombine.low %v509_v14, %v513_v36  ;;  %v4988_v29 = vcombine.high %v517_v45, %v521_v48  ;;  %v5217_v14 = vld [vmem:[%s7266_s2 + $0x20] sm:$0xff]  }
 0x1e0   :  { %v6907_v4 = vpop.f32.mrb[4].mxu0  ;;  %v6915_v56 = vpop.f32.mrb[4].mxu1  ;;  %v4990_v63 = vcombine.high %v518_v50, %v522_v51  ;;  %v4989_v40 = vcombine.low %v518_v50, %v522_v51  ;;  %v5218_v36 = vld [vmem:[%s7266_s2 + $0xa0] sm:$0xff]   ;;  %v5227_v50 = vld [vmem:[%s7266_s2 + $0x78] sm:$0xff]  }
 0x1e1   :  { %v6917_v6 = vpop.f32.mrb[5].mxu0  ;;  %v6925_v62 = vpop.f32.mrb[5].mxu1  ;;  %v5228_v51 = vld [vmem:[%s7266_s2 + $0xf8] sm:$0xff]  }
 0x1e2   :  { %v3368_v10 = vpop.f32.mrb[6].mxu0  ;;  %3743 = vmatpush1.bf16.msra.mxu0 %v4939_v42  ;;  %v3572_v12 = vpop.f32.mrb[6].mxu1  ;;  %3947 = vmatpush1.bf16.msra.mxu1 %v4941_v2  ;;  %v529_v42 = vld [vmem:[%s7264_s1 + $0xfb0] sm:$0xff]  ;;  %v526_v2 = vld [vmem:[%s7264_s1 + $0xf98] sm:$0xff] }
 0x1e3   :  { %v3369_v52 = vpop.f32.mrb[7].mxu0  ;;  %3744 = vmatprep.subr.bf16.mxu0 %v4948_v3  ;;  %v3573_v16 = vpop.f32.mrb[7].mxu1  ;;  %3948 = vmatprep.subr.bf16.mxu1 %v4950_v5  ;;  %v530_v3 = vld [vmem:[%s7264_s1 + $0xfb8] sm:$0xff]  ;;  %v4987_v5 = vcombine.low %v517_v45, %v521_v48  ;;  %v4996_v55 = vcombine.high %v525_v1, %v529_v42  ;;  %v537_v10 = vld [vmem:[%s7264_s1 + $0xff0] sm:$0xff] }
 0x1e4   :  { %v4998_v8 = vcombine.high %v526_v2, %v530_v3  ;;  %v538_v12 = vld [vmem:[%s7264_s1 + $0xff8] sm:$0xff]  ;;  %v4995_v52 = vcombine.low %v525_v1, %v529_v42  ;;  %v5225_v45 = vld [vmem:[%s7266_s2 + $0x30] sm:$0xff]   ;;  %v3984_v42 = vmul.f32 %v6877_v44, %v6877_v44  ;;  %v3990_v44 = vmul.f32 %v6893_v57, %v6893_v57 }
 0x1e5   :  { %v5226_v48 = vld [vmem:[%s7266_s2 + $0xb0] sm:$0xff]  }
 0x1e6   :  { %3745 = vmatpush1.bf16.msra.mxu0 %v4947_v11  ;;  %3949 = vmatpush1.bf16.msra.mxu1 %v4949_v13  ;;  %v534_v11 = vld [vmem:[%s7264_s1 + $0xfd8] sm:$0xff]  ;;  %v4997_v13 = vcombine.low %v526_v2, %v530_v3  ;;  %v3986_v2 = vmul.f32 %v6885_v46, %v6885_v46  ;;  %v3987_v3 = vmul.f32 %v6887_v47, %v6887_v47 }
 0x1e7   :  { %3746 = vmatprep.subr.bf16.mxu0 %v4956_v15  ;;  %3950 = vmatprep.subr.bf16.mxu1 %v4958_v7  ;;  %v5004_v15 = vcombine.high %v533_v9, %v537_v10  ;;  %v5006_v16 = vcombine.high %v534_v11, %v538_v12  ;;  %v5003_v7 = vcombine.low %v533_v9, %v537_v10 }
 0x1e8   :  { %v5005_v17 = vcombine.low %v534_v11, %v538_v12 }
 0x1ea   :  { %3747 = vmatpush1.bf16.msra.mxu0 %v4955_v21  ;;  %3951 = vmatpush1.bf16.msra.mxu1 %v4957_v23  ;;  %v5202_v21 = vld [vmem:[%s7266_s2 + $0x80] sm:$0xff]   ;;  %v5203_v23 = vld [vmem:[%s7266_s2 + $0x48] sm:$0xff]  }
 0x1eb   :  { %3748 = vmatprep.subr.bf16.mxu0 %v4964_v24  ;;  %3952 = vmatprep.subr.bf16.mxu1 %v4966_v19  ;;  %v5204_v24 = vld [vmem:[%s7266_s2 + $0xc8] sm:$0xff]  }
 0x1ec   :  { %v5205_v19 = vld [vmem:[%s7266_s2 + $0x8] sm:$0xff]  }
 0x1ee   :  { %3749 = vmatpush1.bf16.msra.mxu0 %v4963_v30  ;;  %3953 = vmatpush1.bf16.msra.mxu1 %v4965_v31  ;;  %v5213_v30 = vld [vmem:[%s7266_s2 + $0x18] sm:$0xff]  }
 0x1ef   :  { %3750 = vmatprep.subr.bf16.mxu0 %v4972_v32  ;;  %3954 = vmatprep.subr.bf16.mxu1 %v4974_v27  ;;  %v5214_v31 = vld [vmem:[%s7266_s2 + $0x98] sm:$0xff]   ;;  %v5215_v32 = vld [vmem:[%s7266_s2 + $0x60] sm:$0xff]  }
 0x1f0   :  { %v5216_v27 = vld [vmem:[%s7266_s2 + $0xe0] sm:$0xff]  }
 0x1f2   :  { %3751 = vmatpush1.bf16.msra.mxu0 %v4971_v39  ;;  %3955 = vmatpush1.bf16.msra.mxu1 %v4973_v41  ;;  %v5221_v39 = vld [vmem:[%s7266_s2 + $0x28] sm:$0xff]  }
 0x1f3   :  { %3752 = vmatprep.subr.bf16.mxu0 %v4980_v43  ;;  %3956 = vmatprep.subr.bf16.mxu1 %v4982_v20  ;;  %v5222_v41 = vld [vmem:[%s7266_s2 + $0xa8] sm:$0xff]   ;;  %v5223_v43 = vld [vmem:[%s7266_s2 + $0x70] sm:$0xff]  }
 0x1f4   :  { %v5224_v20 = vld [vmem:[%s7266_s2 + $0xf0] sm:$0xff]  }
 0x1f6   :  { %3753 = vmatpush1.bf16.msra.mxu0 %v4979_v59  ;;  %3957 = vmatpush1.bf16.msra.mxu1 %v4981_v60  ;;  %v5229_v59 = vld [vmem:[%s7266_s2 + $0x38] sm:$0xff]  }
 0x1f7   :  { %3754 = vmatprep.subr.bf16.mxu0 %v4988_v29  ;;  %3958 = vmatprep.subr.bf16.mxu1 %v4990_v63  ;;  %v5230_v60 = vld [vmem:[%s7266_s2 + $0xb8] sm:$0xff]   ;;  %v3983_v29 = vmul.f32 %v6867_v35, %v6867_v35  ;;  %v3985_v63 = vmul.f32 %v6875_v22, %v6875_v22  ;;  %v3988_v35 = vmul.f32 %v6891_v33, %v6891_v33 }
 0x1fa   :  { %3755 = vmatpush1.bf16.msra.mxu0 %v4987_v5  ;;  %3959 = vmatpush1.bf16.msra.mxu1 %v4989_v40 }
 0x1fb   :  { %3756 = vmatprep.subr.bf16.mxu0 %v4996_v55  ;;  %3960 = vmatprep.subr.bf16.mxu1 %v4998_v8  ;;  %v3989_v8 = vmul.f32 %v6889_v49, %v6889_v49 }
 0x1fe   :  { %3757 = vmatpush1.bf16.msra.mxu0 %v4995_v52  ;;  %3961 = vmatpush1.bf16.msra.mxu1 %v4997_v13 }
 0x1ff   :  { %3758 = vmatprep.subr.bf16.mxu0 %v5004_v15  ;;  %3962 = vmatprep.subr.bf16.mxu1 %v5006_v16 }
 0x202   :  { %3759 = vmatpush1.bf16.msra.mxu0 %v5003_v7  ;;  %3963 = vmatpush1.bf16.msra.mxu1 %v5005_v17 }
 0x203   :  { %5039 = vmatprep.subr.bf16.mxu0 %v5199_v18  ;;  %5067 = vmatprep.subr.bf16.mxu1 %v5200_v54 }
 0x205   :  { %3761 = vmatmul.mubr.bf16.vlgmr.msra.gmra.mrb[8].mxu0 %v6184_v38  ;;  %3965 = vmatmul.mubr.bf16.vlgmr.msra.gmra.mrb[8].mxu1 %v6184_v38  ;;  %v5207_v38 = vld [vmem:[%s7266_s2 + $0x50] sm:$0xff]  }
 0x206   :  { %3770 = vmatprep.mubr.bf16.mxu0 %v6195_v53  ;;  %3974 = vmatprep.mubr.bf16.mxu1 %v6195_v53  ;;  %v5208_v53 = vld [vmem:[%s7266_s2 + $0xd0] sm:$0xff]  }
 0x207   :  { %5040 = vmatpush3.bf16.msra.mxu0 %v5201_v0  ;;  %5068 = vmatpush3.bf16.msra.mxu1 %v5202_v21 }
 0x208   :  { %5041 = vmatprep.subr.bf16.mxu0 %v5203_v23  ;;  %5069 = vmatprep.subr.bf16.mxu1 %v5204_v24  ;;  %v3991_v24 = vmul.f32 %v6907_v4, %v6907_v4  ;;  %v3994_v4 = vmul.f32 %v6925_v62, %v6925_v62 }
 0x20b   :  { %5042 = vmatpush3.bf16.msra.mxu0 %v5205_v19  ;;  %5070 = vmatpush3.bf16.msra.mxu1 %v5206_v25  ;;  %v3993_v19 = vmul.f32 %v6915_v56, %v6915_v56 }
 0x20c   :  { %5043 = vmatprep.subr.bf16.mxu0 %v5207_v38  ;;  %5071 = vmatprep.subr.bf16.mxu1 %v5208_v53 }
 0x20d   :  { %3771 = vmatmul.mubr.bf16.gmra.mrb[12].mxu0 %v6219_v61  ;;  %3975 = vmatmul.mubr.bf16.gmra.mrb[12].mxu1 %v6219_v61  ;;  %v5211_v61 = vld [vmem:[%s7266_s2 + $0x58] sm:$0xff]  }
 0x20f   :  { %5044 = vmatpush3.bf16.msra.mxu0 %v5209_v58  ;;  %5072 = vmatpush3.bf16.msra.mxu1 %v5210_v26  ;;  %v3992_v58 = vmul.f32 %v6917_v6, %v6917_v6 }
 0x210   :  { %5045 = vmatprep.subr.bf16.mxu0 %v5211_v61  ;;  %5073 = vmatprep.subr.bf16.mxu1 %v5212_v28 }
 0x213   :  { %5046 = vmatpush3.bf16.msra.mxu0 %v5213_v30  ;;  %5074 = vmatpush3.bf16.msra.mxu1 %v5214_v31 }
 0x214   :  { %5047 = vmatprep.subr.bf16.mxu0 %v5215_v32  ;;  %5075 = vmatprep.subr.bf16.mxu1 %v5216_v27 }
 0x217   :  { %5048 = vmatpush3.bf16.msra.mxu0 %v5217_v14  ;;  %5076 = vmatpush3.bf16.msra.mxu1 %v5218_v36 }
 0x218   :  { %5049 = vmatprep.subr.bf16.mxu0 %v5219_v37  ;;  %5077 = vmatprep.subr.bf16.mxu1 %v5220_v34 }
 0x21b   :  { %5050 = vmatpush3.bf16.msra.mxu0 %v5221_v39  ;;  %5078 = vmatpush3.bf16.msra.mxu1 %v5222_v41 }
 0x21c   :  { %5051 = vmatprep.subr.bf16.mxu0 %v5223_v43  ;;  %5079 = vmatprep.subr.bf16.mxu1 %v5224_v20 }
 0x21f   :  { %5052 = vmatpush3.bf16.msra.mxu0 %v5225_v45  ;;  %5080 = vmatpush3.bf16.msra.mxu1 %v5226_v48 }
 0x220   :  { %5053 = vmatprep.subr.bf16.mxu0 %v5227_v50  ;;  %5081 = vmatprep.subr.bf16.mxu1 %v5228_v51 }
 0x223   :  { %5054 = vmatpush3.bf16.msra.mxu0 %v5229_v59  ;;  %5082 = vmatpush3.bf16.msra.mxu1 %v5230_v60 }
 0x2d8   :  { %v3762_v1 = vpop.f32.mrb[8].mxu0  ;;  %v3966_v40 = vpop.f32.mrb[8].mxu1 }
 0x2d9   :  { %v3995_v5 = vmul.f32 %v3762_v1, %v3762_v1  ;;  %v3764_v55 = vpop.f32.mrb[9].mxu0  ;;  %v3997_v22 = vmul.f32 %v3966_v40, %v3966_v40  ;;  %v3968_v10 = vpop.f32.mrb[9].mxu1 }
 0x2da   :  { %v3996_v9 = vmul.f32 %v3764_v55, %v3764_v55  ;;  %v3766_v11 = vpop.f32.mrb[10].mxu0  ;;  %v3998_v12 = vmul.f32 %v3968_v10, %v3968_v10  ;;  %v3970_v52 = vpop.f32.mrb[10].mxu1 }
 0x2db   :  { %v7117_v46 = vadd.f32 %v3995_v5, %v3983_v29  ;;  %v3999_v47 = vmul.f32 %v3766_v11, %v3766_v11  ;;  %v3768_v13 = vpop.f32.mrb[11].mxu0  ;;  %v7119_v15 = vadd.f32 %v3997_v22, %v3985_v63  ;;  %v4001_v49 = vmul.f32 %v3970_v52, %v3970_v52  ;;  %v3972_v33 = vpop.f32.mrb[11].mxu1 }
 0x2dc   :  { %v7121_v16 = vadd.f32 %v3996_v9, %v3984_v42  ;;  %v4000_v7 = vmul.f32 %v3768_v13, %v3768_v13  ;;  %v7124_v17 = vadd.f32 %v3998_v12, %v3986_v2  ;;  %v4002_v57 = vmul.f32 %v3972_v33, %v3972_v33 }
 0x2dd   :  { %5231 = vrsqrt.f32 %v7117_v46  ;;  %v7126_v18 = vadd.f32 %v3999_v47, %v3987_v3  ;;  %v7129_v54 = vadd.f32 %v4001_v49, %v3989_v8  ;;  %vm4021_vm4 = vcmp.eq.f32.partialorder %v7117_v46, inf }
 0x2de   :  { %5233 = vrsqrt.f32 %v7119_v15  ;;  %v7131_v0 = vadd.f32 %v4000_v7, %v3988_v35  ;;  %v7134_v21 = vadd.f32 %v4002_v57, %v3990_v44  ;;  %vm4028_vm0 = vcmp.eq.f32.partialorder %v7121_v16, inf }
 0x2df   :  { %5235 = vrsqrt.f32 %v7121_v16  ;;  %v4031_v62 = vand.u32 2147483648, %v7121_v16  ;;  %vm4042_vm1 = vcmp.eq.f32.partialorder %v7124_v17, inf  ;;  %vm4030_vm2 = vcmp.eq.f32.partialorder %v7121_v16, 0.0 }
 0x2e0   :  { %5237 = vrsqrt.f32 %v7124_v17  ;;  %v3772_v23 = vpop.f32.mrb[12].mxu0  ;;  %v3976_v38 = vpop.f32.mrb[12].mxu1  ;;  %v4059_v34 = vand.u32 2147483648, %v7131_v0  ;;  %vm4056_vm3 = vcmp.eq.f32.partialorder %v7131_v0, inf  ;;  %v4045_v41 = vand.u32 2147483648, %v7124_v17 }
 0x2e1   :  { %5239 = vrsqrt.f32 %v7126_v18  ;;  %v4003_v25 = vmul.f32 %v3772_v23, %v3772_v23  ;;  %v3774_v53 = vpop.f32.mrb[13].mxu0  ;;  %v4005_v26 = vmul.f32 %v3976_v38, %v3976_v38  ;;  %v3978_v28 = vpop.f32.mrb[13].mxu1  ;;  %v4073_v43 = vand.u32 2147483648, %v7134_v21 }
 0x2e2   :  { %5241 = vrsqrt.f32 %v7129_v54  ;;  %v4004_v61 = vmul.f32 %v3774_v53, %v3774_v53  ;;  %v3776_v30 = vpop.f32.mrb[14].mxu0  ;;  %v4006_v31 = vmul.f32 %v3978_v28, %v3978_v28  ;;  %v3980_v32 = vpop.f32.mrb[14].mxu1  ;;  %vm4058_vm5 = vcmp.eq.f32.partialorder %v7131_v0, 0.0 }
 0x2e3   :  { %5243 = vrsqrt.f32 %v7131_v0  ;;  %v7148_v56 = vadd.f32 %v4003_v25, %v3991_v24  ;;  %v3777_v27 = vpop.f32.mrb[15].mxu0  ;;  %v7151_v14 = vadd.f32 %v4005_v26, %v3993_v19  ;;  %v3981_v36 = vpop.f32.mrb[15].mxu1  ;;  %vm4070_vm6 = vcmp.eq.f32.partialorder %v7134_v21, inf }
 0x2e4   :  { %5245 = vrsqrt.f32 %v7134_v21  ;;  %v7153_v6 = vadd.f32 %v4004_v61, %v3992_v58  ;;  %v7156_v37 = vadd.f32 %v4006_v31, %v3994_v4  ;;  %vm4023_vm7 = vcmp.eq.f32.partialorder %v7117_v46, 0.0 }
 0x2e5   :  { %5247 = vrsqrt.f32 %v7148_v56  ;;  %v4024_v48 = vand.u32 2147483648, %v7117_v46  ;;  %vm4044_vm8 = vcmp.eq.f32.partialorder %v7124_v17, 0.0  ;;  %vm4072_vm9 = vcmp.eq.f32.partialorder %v7134_v21, 0.0 }
 0x2e6   :  { %5249 = vrsqrt.f32 %v7151_v14  ;;  %vm4049_vm10 = vcmp.eq.f32.partialorder %v7126_v18, inf  ;;  %vm4051_vm11 = vcmp.eq.f32.partialorder %v7126_v18, 0.0  ;;  %v4052_v51 = vand.u32 2147483648, %v7126_v18 }
 0x2e7   :  { %v5232_v39 = vpop.eup %5231  ;;  %5251 = vrsqrt.f32 %v7153_v6  ;;  %vm4035_vm12 = vcmp.eq.f32.partialorder %v7119_v15, inf  ;;  %vm4037_vm13 = vcmp.eq.f32.partialorder %v7119_v15, 0.0  ;;  %v4038_v3 = vand.u32 2147483648, %v7119_v15 }
 0x2e8   :  { %v5234_v20 = vpop.eup %5233  ;;  %5253 = vrsqrt.f32 %v7156_v37  ;;  %v4020_v45 = vmul.f32 %v5232_v39, %v7117_v46  ;;  %vm4063_vm14 = vcmp.eq.f32.partialorder %v7129_v54, inf  ;;  %vm4065_vm15 = vcmp.eq.f32.partialorder %v7129_v54, 0.0 }
 0x2e9   :  { %v5236_v50 = vpop.eup %5235  ;;  %v4034_v59 = vmul.f32 %v5234_v20, %v7119_v15  ;;  %v4066_v55 = vand.u32 2147483648, %v7129_v54  ;;  %v4087_v47 = vand.u32 2147483648, %v7153_v6 }
 0x2ea   :  { %v5238_v60 = vpop.eup %5237  ;;  %v4027_v29 = vmul.f32 %v5236_v50, %v7121_v16  ;;  %v4022_v63 = vsel %vm4021_vm4, %v7117_v46, %v4020_v45  ;;  %vm4084_vm4 = vcmp.eq.f32.partialorder %v7153_v6, inf }
 0x2eb   :  { %v5240_v1 = vpop.eup %5239  ;;  %v4041_v42 = vmul.f32 %v5238_v60, %v7124_v17  ;;  %v4036_v2 = vsel %vm4035_vm12, %v7119_v15, %v4034_v59  ;;  %v4025_v22 = vsel %vm4023_vm7, %v4024_v48, %v4022_v63  ;;  %vm4086_vm12 = vcmp.eq.f32.partialorder %v7153_v6, 0.0 }
 0x2ec   :  { %v5242_v5 = vpop.eup %5241  ;;  %v4048_v40 = vmul.f32 %v5240_v1, %v7126_v18  ;;  %v4029_v35 = vsel %vm4028_vm0, %v7121_v16, %v4027_v29  ;;  %v4039_v12 = vsel %vm4037_vm13, %v4038_v3, %v4036_v2  ;;  %vm4098_vm0 = vcmp.eq.f32.partialorder %v7156_v37, inf }
 0x2ed   :  { %v5244_v8 = vpop.eup %5243  ;;  %v4062_v9 = vmul.f32 %v5242_v5, %v7129_v54  ;;  %v4043_v46 = vsel %vm4042_vm1, %v7124_v17, %v4041_v42  ;;  %v4032_v15 = vsel %vm4030_vm2, %v4031_v62, %v4029_v35  ;;  %vm4100_vm1 = vcmp.eq.f32.partialorder %v7156_v37, 0.0 }
 0x2ee   :  { %v5246_v10 = vpop.eup %5245  ;;  %v4055_v11 = vmul.f32 %v5244_v8, %v7131_v0  ;;  %v4050_v44 = vsel %vm4049_vm10, %v7126_v18, %v4048_v40  ;;  %v4046_v26 = vsel %vm4044_vm8, %v4045_v41, %v4043_v46  ;;  %v4101_v17 = vand.u32 2147483648, %v7156_v37 }
 0x2ef   :  { %v5248_v52 = vpop.eup %5247  ;;  %v4069_v13 = vmul.f32 %v5246_v10, %v7134_v21  ;;  %v4053_v49 = vsel %vm4051_vm11, %v4052_v51, %v4050_v44  ;;  %v4064_v7 = vsel %vm4063_vm14, %v7129_v54, %v4062_v9  ;;  %vm4077_vm2 = vcmp.eq.f32.partialorder %v7148_v56, inf }
 0x2f0   :  { %v5250_v33 = vpop.eup %5249  ;;  %v4057_v57 = vsel %vm4056_vm3, %v7131_v0, %v4055_v11  ;;  %v4103_v23 = vpack.c.bf16 %v4053_v49, %v4025_v22  ;;  %v4067_v24 = vsel %vm4065_vm15, %v4066_v55, %v4064_v7  ;;  %v4076_v16 = vmul.f32 %v5248_v52, %v7148_v56 }
 0x2f1   :  { %v5252_v19 = vpop.eup %5251  ;;  %v4060_v18 = vsel %vm4058_vm5, %v4059_v34, %v4057_v57  ;;  %v4071_v25 = vsel %vm4070_vm6, %v7134_v21, %v4069_v13  ;;  %v4105_v38 = vpack.c.bf16 %v4067_v24, %v4039_v12  ;;  %v4090_v30 = vmul.f32 %v5250_v33, %v7151_v14 }
 0x2f2   :  { %v5254_v53 = vpop.eup %5253  ;;  %v4104_v58 = vpack.c.bf16 %v4060_v18, %v4032_v15  ;;  %v4074_v54 = vsel %vm4072_vm9, %v4073_v43, %v4071_v25  ;;  %v4083_v61 = vmul.f32 %v5252_v19, %v7153_v6  ;;  %v4078_v32 = vsel %vm4077_vm2, %v7148_v56, %v4076_v16 }
 0x2f3   :  { %v4106_v28 = vpack.c.bf16 %v4074_v54, %v4046_v26  ;;  %v4097_v0 = vmul.f32 %v5254_v53, %v7156_v37  ;;  %vm4091_vm3 = vcmp.eq.f32.partialorder %v7151_v14, inf  ;;  %v4080_v62 = vand.u32 2147483648, %v7148_v56 }
 0x2f4   :  { %4399 = vmatprep.mubr.bf16.mxu0 %v4104_v58  ;;  %v4085_v4 = vsel %vm4084_vm4, %v7153_v6, %v4083_v61  ;;  %v4092_v34 = vsel %vm4091_vm3, %v7151_v14, %v4090_v30  ;;  %vm4079_vm5 = vcmp.eq.f32.partialorder %v7148_v56, 0.0  ;;  %v4094_v41 = vand.u32 2147483648, %v7151_v14 }
 0x2f5   :  { %4447 = vmatprep.mubr.bf16.mxu1 %v4106_v28  ;;  %4400 = vmatmul.mubr.bf16.vlgmr.msra.gmra.mrb[16].mxu0 %v4103_v23  ;;  %v4088_v21 = vsel %vm4086_vm12, %v4087_v47, %v4085_v4  ;;  %v4099_v31 = vsel %vm4098_vm0, %v7156_v37, %v4097_v0  ;;  %v4081_v6 = vsel %vm4079_vm5, %v4080_v62, %v4078_v32  ;;  %vm4093_vm6 = vcmp.eq.f32.partialorder %v7151_v14, 0.0 }
 0x2f6   :  { %4448 = vmatmul.mubr.bf16.vlgmr.msra.gmra.mrb[16].mxu1 %v4105_v38  ;;  %v4108_v27 = vpack.c.bf16 %v4088_v21, %v4088_v21  ;;  %v4102_v36 = vsel %vm4100_vm1, %v4101_v17, %v4099_v31  ;;  %v4095_v37 = vsel %vm4093_vm6, %v4094_v41, %v4092_v34  ;;  %v4107_v43 = vpack.c.bf16 %v4081_v6, %v4081_v6 }
 0x2f7   :  { %v4110_v39 = vpack.c.bf16 %v4102_v36, %v4102_v36  ;;  %v4109_v20 = vpack.c.bf16 %v4095_v37, %v4095_v37 }
 0x2f8   :  { %4407 = vmatprep.mubr.bf16.mxu0 %v4108_v27 }
 0x2f9   :  { %4455 = vmatprep.mubr.bf16.mxu1 %v4110_v39 }
 0x2fd   :  { %4408 = vmatmul.mubr.bf16.gmra.mrb[20].mxu0 %v4107_v43 }
 0x2fe   :  { %4456 = vmatmul.mubr.bf16.gmra.mrb[20].mxu1 %v4109_v20 }
 0x3c8   :  { %v5055_v45 = vpop.f32.mrb[16].mxu0 }
 0x3c9   :  { %v5083_v48 = vpop.f32.mrb[16].mxu1  ;;  %v5056_v50 = vpop.f32.mrb[17].mxu0 }
 0x3ca   :  { %v5057_v51 = vadd.f32 %v5056_v50, %v5055_v45  ;;  %v5084_v59 = vpop.f32.mrb[17].mxu1  ;;  %v5058_v60 = vpop.f32.mrb[18].mxu0 }
 0x3cb   :  { %v5085_v29 = vadd.f32 %v5084_v59, %v5083_v48  ;;  %v5086_v56 = vpop.f32.mrb[18].mxu1  ;;  %v5059_v63 = vpop.f32.mrb[19].mxu0 }
 0x3cc   :  { %v5060_v1 = vadd.f32 %v5059_v63, %v5058_v60  ;;  %v5087_v42 = vpop.f32.mrb[19].mxu1 }
 0x3cd   :  { %v4450_v2 = vadd.f32 %v5085_v29, %v5057_v51  ;;  %v5088_v3 = vadd.f32 %v5087_v42, %v5086_v56 }
 0x3cf   :  { %v4463_v14 = vmax.f32 %v4450_v2, 1e-07  ;;  %v4453_v5 = vadd.f32 %v5088_v3, %v5060_v1 }
 0x3d0   :  { %v5061_v40 = vpop.f32.mrb[20].mxu0 }
 0x3d1   :  { %5255 = vlog2.f32 %v4463_v14  ;;  %v4464_v55 = vmax.f32 %v4453_v5, 1e-07  ;;  %v5089_v8 = vpop.f32.mrb[20].mxu1  ;;  %v5062_v35 = vpop.f32.mrb[21].mxu0 }
 0x3d2   :  { %v5063_v22 = vadd.f32 %v5062_v35, %v5061_v40  ;;  %v5090_v9 = vpop.f32.mrb[21].mxu1  ;;  %v5064_v10 = vpop.f32.mrb[22].mxu0 }
 0x3d3   :  { %5257 = vlog2.f32 %v4464_v55  ;;  %v5091_v11 = vadd.f32 %v5090_v9, %v5089_v8  ;;  %v5092_v44 = vpop.f32.mrb[22].mxu1  ;;  %v5065_v12 = vpop.f32.mrb[23].mxu0 }
 0x3d4   :  { %v5093_v47 = vpop.f32.mrb[23].mxu1 }
 0x3d5   :  { %v4458_v52 = vadd.f32 %v5091_v11, %v5063_v22 }
 0x3d7   :  { %v4465_v46 = vmax.f32 %v4458_v52, 1e-07 }
 0x3d9   :  { %5259 = vlog2.f32 %v4465_v46 }
 0x3db   :  { %v5256_v13 = vpop.eup %5255 }
 0x3dc   :  { %v4467_v49 = vmul.f32 0.6931472, %v5256_v13 }
 0x3dd   :  { %v5258_v7 = vpop.eup %5257 }
 0x3de   :  { %4472 = vst [vmem:[%s7267_s3] sm:$0xff] %v4467_v49  ;;  %v4469_v33 = vmul.f32 0.6931472, %v5258_v7 }
 0x3e0   :  { %4473 = vst [vmem:[%s7267_s3 + $0x8] sm:$0xff] %v4469_v33 }
 0x3e3   :  { %v5260_v15 = vpop.eup %5259 }
 0x3e4   :  { %v4471_v57 = vmul.f32 0.6931472, %v5260_v15 }
 0x3e6   :  { %4474 = vst [vmem:[%s7267_s3 + $0x10] sm:$0xff] %v4471_v57 }

</bundles_post_ra>
